<compile_context>
chip_gen: v6e
topology: v6e:2x2x1
jax: 0.10.0
libtpu: 0.0.40
codegen_flags: <defaults>
</compile_context>

<pallas_src>
import functools
import math

import jax
import jax.numpy as jnp
from jax import lax
from jax.experimental import pallas as pl
from jax.experimental.pallas import tpu as pltpu


# --------------------------------------------------------------------------
# Kernel 1: fused QKV projection, output layout (B, S, 3E)
# --------------------------------------------------------------------------
def _qkv_proj_kernel(x_ref, w_ref, qkv_ref):
    """One grid step = (batch b, sequence tile si).

    x_ref   : (1, TS, E)   VMEM  input tile
    w_ref   : (E, 3E)      VMEM  fused [Wq*scale | Wk | Wv], resident (const index)
    qkv_ref : (1, TS, 3E)  VMEM  fused Q/K/V output, fully lane-dense store
    """
    qkv_ref[0] = jnp.dot(
        x_ref[0], w_ref[...], preferred_element_type=jnp.float32
    ).astype(qkv_ref.dtype)


# --------------------------------------------------------------------------
# Kernel 2: attention (all heads in one step) + single output projection
# --------------------------------------------------------------------------
def _attn_kernel(q_ref, k_ref, v_ref, wo_ref, bo_ref, out_ref, att_ref, ctx_ref,
                 *, num_heads, depth):
    """One grid step = (batch b, query tile qi); heads are a static in-kernel loop.

    q_ref  : (1, TQ, E)  VMEM  query tile, all heads packed on lanes (scale pre-folded)
    k_ref  : (1, S,  E)  VMEM  full keys for batch b   (resident across qi)
    v_ref  : (1, S,  E)  VMEM  full values for batch b (resident across qi)
    wo_ref : (E, E)      VMEM  fc weight (resident, constant index_map)
    bo_ref : (1, E)      VMEM  fc bias   (resident, constant index_map)
    out_ref: (1, TQ, E)  VMEM  projected output
    att_ref: (1, H, TQ, S) VMEM attention probabilities (lane-dense last dim S)
    ctx_ref: (TQ, E) f32 scratch -- per-head context written at lane offset h*d
    """
    q = q_ref[0]                                   # (TQ, E)
    k = k_ref[0]                                   # (S,  E)
    v = v_ref[0]                                   # (S,  E)

    for h in range(num_heads):                     # static loop -> static lane slices
        lo = h * depth
        qh = q[:, lo:lo + depth]                   # (TQ, d)
        kh = k[:, lo:lo + depth]                   # (S,  d)
        vh = v[:, lo:lo + depth]                   # (S,  d)

        # scores = qh @ kh^T, contracting the last dims directly (no transpose).
        s = lax.dot_general(qh, kh, (((1,), (1,)), ((), ())),
                            preferred_element_type=jnp.float32)   # (TQ, S)

        # Numerically stable softmax, exact division (rows sum to 1).
        s = s - jnp.max(s, axis=-1, keepdims=True)
        e = jnp.exp(s)
        p = e / jnp.sum(e, axis=-1, keepdims=True)                # (TQ, S)

        # Lane-dense store of attention weights for this head.
        att_ref[0, h] = p.astype(att_ref.dtype)

        # ctx_h = P @ V_h -> written into the f32 scratch at lane offset h*d.
        ctx_ref[:, lo:lo + depth] = jnp.dot(p.astype(vh.dtype), vh,
                                            preferred_element_type=jnp.float32)

    # Single full-depth output projection: (TQ,E) @ (E,E), f32 accumulation.
    out = jnp.dot(ctx_ref[...].astype(wo_ref.dtype), wo_ref[...],
                  preferred_element_type=jnp.float32)
    out_ref[0] = (out + bo_ref[...].astype(jnp.float32)).astype(out_ref.dtype)

    # TODO(synk): pad_mask / attention-dropout paths of the PyTorch forward are
    # not exercised here (pad_mask=None, att_dropout=0.0).
    # TODO(synk): K/V are kept whole-S per batch; for very long S (VMEM-bound,
    # esp. v7x's 64 MiB/TC) this should become a flash-style online softmax
    # that tiles K/V.


# --------------------------------------------------------------------------
# VMEM budget derived from the actual chip generation
# --------------------------------------------------------------------------
def _vmem_limit_bytes():
    # v7x has 64 MiB/TC, v5e/v6e have 128 MiB; take half as the scoped budget
    # (double-buffered inputs need headroom).  Falls back to 32 MiB.
    try:
        info = pltpu.get_tpu_info()
        cap = getattr(info, "vmem_capacity_bytes", None)
        if cap:
            return int(cap) // 2
    except Exception:
        pass
    return 32 * 1024 * 1024


# --------------------------------------------------------------------------
# Wrapper
# --------------------------------------------------------------------------
def multi_head_attention(x, wq, wk, wv, w_fc, b_fc, *, num_heads,
                         block_q=128, block_s=128,
                         att_dtype=None, compute_dtype=None):
    """x: (B, S, E); wq/wk/wv/w_fc: PyTorch-style (out, in) weights; b_fc: (E,).

    att_dtype     : dtype of the returned attention weights (default: x.dtype).
                    Pass jnp.bfloat16 to halve the O(S^2) HBM write.
    compute_dtype : dtype of MXU operands / stored Q,K,V (default: x.dtype).
                    Pass jnp.bfloat16 for f32 inputs to trade ~1e-2 accuracy for
                    2-4x MXU throughput and half the Q/K/V HBM traffic.
    """
    B, S, E = x.shape
    assert E % num_heads == 0, "emb_dim must be divisible by num_heads"
    d = E // num_heads
    scale = 1.0 / math.sqrt(d)

    out_dt = x.dtype
    cdt = compute_dtype if compute_dtype is not None else x.dtype
    adt = att_dtype if att_dtype is not None else x.dtype

    ts = min(block_s, S)
    tq = min(block_q, S)
    assert S % ts == 0 and S % tq == 0, "seq len must be divisible by the tile sizes"
    assert E % 128 == 0, "emb_dim should be a multiple of 128 for lane-dense blocks"

    # Host-side (one time) weight prep:
    #   fused W_qkv : (E, 3E) = [Wq^T * 1/sqrt(d) | Wk^T | Wv^T]
    #   Wo          : (E, E)  = fc.weight^T
    w_qkv = jnp.concatenate(
        [wq.T.astype(jnp.float32) * scale, wk.T.astype(jnp.float32),
         wv.T.astype(jnp.float32)], axis=1).astype(cdt)            # (E, 3E)
    wo = w_fc.T.astype(cdt)                                        # (E, E)
    bo = b_fc.reshape(1, E).astype(jnp.float32)                    # (1, E)
    x_c = x.astype(cdt)

    vmem_limit = _vmem_limit_bytes()

    # ---- Kernel 1: fused QKV projection into (B, S, 3E) -------------------
    # Grid (B, S//ts): both axes parallel; B*(S//ts) >= 2 so both v7x cores work.
    qkv_grid = pltpu.PrefetchScalarGridSpec(
        num_scalar_prefetch=0,
        grid=(B, S // ts),
        in_specs=[
            pl.BlockSpec((1, ts, E), lambda b, si: (b, si, 0)),    # x tile
            pl.BlockSpec((E, 3 * E), lambda b, si: (0, 0)),        # fused W (resident)
        ],
        out_specs=pl.BlockSpec((1, ts, 3 * E), lambda b, si: (b, si, 0)),
    )
    qkv = pl.pallas_call(
        _qkv_proj_kernel,
        out_shape=jax.ShapeDtypeStruct((B, S, 3 * E), cdt),
        grid_spec=qkv_grid,
        compiler_params=pltpu.CompilerParams(
            dimension_semantics=("parallel", "parallel"),
            vmem_limit_bytes=vmem_limit),
    )(x_c, w_qkv)

    # ---- Kernel 2: attention (all heads per step) + output projection -----
    # Same (B, S, 3E) array is read through three windows (Q tile, full K, full V).
    # K/V index_maps ignore qi -> blocks stay VMEM-resident across query tiles.
    attn_grid = pltpu.PrefetchScalarGridSpec(
        num_scalar_prefetch=0,
        grid=(B, S // tq),
        in_specs=[
            pl.BlockSpec((1, tq, E), lambda b, qi: (b, qi, 0)),    # Q tile
            pl.BlockSpec((1, S, E), lambda b, qi: (b, 0, 1)),      # K (whole S)
            pl.BlockSpec((1, S, E), lambda b, qi: (b, 0, 2)),      # V (whole S)
            pl.BlockSpec((E, E), lambda b, qi: (0, 0)),            # Wo (resident)
            pl.BlockSpec((1, E), lambda b, qi: (0, 0)),            # bias (resident)
        ],
        out_specs=[
            pl.BlockSpec((1, tq, E), lambda b, qi: (b, qi, 0)),            # output
            pl.BlockSpec((1, num_heads, tq, S), lambda b, qi: (b, 0, qi, 0)),  # att
        ],
        scratch_shapes=[pltpu.VMEM((tq, E), jnp.float32)],
    )
    out, att = pl.pallas_call(
        functools.partial(_attn_kernel, num_heads=num_heads, depth=d),
        out_shape=(jax.ShapeDtypeStruct((B, S, E), out_dt),
                   jax.ShapeDtypeStruct((B, num_heads, S, S), adt)),
        grid_spec=attn_grid,
        compiler_params=pltpu.CompilerParams(
            dimension_semantics=("parallel", "parallel"),
            vmem_limit_bytes=vmem_limit),
    )(qkv, qkv, qkv, wo, bo)

    return out, att


# --------------------------------------------------------------------------
# Pure-JAX reference (mirrors the PyTorch forward, pad_mask=None, dropout=0)
# --------------------------------------------------------------------------
def _reference(x, wq, wk, wv, w_fc, b_fc, num_heads):
    B, S, E = x.shape
    d = E // num_heads
    Q = (x @ wq.T).reshape(B, S, num_heads, d).transpose(0, 2, 1, 3)
    K = (x @ wk.T).reshape(B, S, num_heads, d).transpose(0, 2, 1, 3)
    V = (x @ wv.T).reshape(B, S, num_heads, d).transpose(0, 2, 1, 3)
    att = jnp.einsum('bhqd,bhkd->bhqk', Q, K) / math.sqrt(d)
    att = jax.nn.softmax(att, axis=-1)
    out = jnp.einsum('bhqk,bhkd->bhqd', att, V)
    out = out.transpose(0, 2, 1, 3).reshape(B, S, E)
    out = out @ w_fc.T + b_fc
    return out, att


if __name__ == "__main__":
    # Small but lane-aligned shapes: batch=2, seq=256, emb_dim=256, heads=4 (d=64).
    B, S, E, H = 2, 256, 256, 4

    key = jax.random.PRNGKey(0)
    kx, kq, kk, kv, kf, kb = jax.random.split(key, 6)

    x = jax.random.normal(kx, (B, S, E), dtype=jnp.float32)

    # PyTorch nn.Linear weight layout: (out_features, in_features).
    bound = 1.0 / math.sqrt(E)
    wq = jax.random.uniform(kq, (E, E), jnp.float32, -bound, bound)
    wk = jax.random.uniform(kk, (E, E), jnp.float32, -bound, bound)
    wv = jax.random.uniform(kv, (E, E), jnp.float32, -bound, bound)
    w_fc = jax.random.uniform(kf, (E, E), jnp.float32, -bound, bound)
    b_fc = jax.random.uniform(kb, (E,), jnp.float32, -bound, bound)

    out, att = multi_head_attention(x, wq, wk, wv, w_fc, b_fc, num_heads=H)
    out = jax.block_until_ready(out)
    att = jax.block_until_ready(att)

    ref_out, ref_att = _reference(x, wq, wk, wv, w_fc, b_fc, H)
    assert out.shape == (B, S, E) and att.shape == (B, H, S, S)
    assert jnp.allclose(att, ref_att, atol=2e-3, rtol=2e-3), \
        f"att max err {jnp.max(jnp.abs(att - ref_att))}"
    assert jnp.allclose(out, ref_out, atol=5e-3, rtol=5e-3), \
        f"out max err {jnp.max(jnp.abs(out - ref_out))}"

    print("KERNEL_OK")
</pallas_src>

<mosaic_0001>
module attributes {stable_mosaic.version = 11 : i64} {
  func.func @_qkv_proj_kernel(%arg0: i32, %arg1: i32, %arg2: memref<1x128x256xf32, #tpu.memory_space<vmem>>, %arg3: memref<256x768xf32, #tpu.memory_space<vmem>>, %arg4: memref<1x128x768xf32, #tpu.memory_space<vmem>>) attributes {dimension_semantics = [#tpu.dimension_semantics<parallel>, #tpu.dimension_semantics<parallel>], iteration_bounds = array<i64: 2, 2>, scalar_prefetch = 0 : i64, scratch_operands = 0 : i64, tpu.core_type = #tpu.core_type<tc>, window_params = [{transform_indices = @transform_0, window_bounds = array<i64: 1, 128, 256>}, {pipeline_mode = #tpu.pipeline_mode<synchronous>, transform_indices = @transform_1, window_bounds = array<i64: 256, 768>}, {transform_indices = @transform_2, window_bounds = array<i64: 1, 128, 768>}]} {
    %c0 = arith.constant 0 : index
    %c0_0 = arith.constant 0 : index
    %c0_1 = arith.constant 0 : index
    %0 = vector.load %arg2[%c0, %c0_0, %c0_1] : memref<1x128x256xf32, #tpu.memory_space<vmem>>, vector<1x128x256xf32>
    %1 = vector.shape_cast %0 : vector<1x128x256xf32> to vector<128x256xf32>
    %c0_2 = arith.constant 0 : index
    %c0_3 = arith.constant 0 : index
    %2 = vector.load %arg3[%c0_2, %c0_3] : memref<256x768xf32, #tpu.memory_space<vmem>>, vector<256x768xf32>
    %cst = arith.constant dense<0.000000e+00> : vector<128x768xf32>
    %3 = tpu.matmul %1, %2, %cst {dimension_numbers = #tpu.dot_dimension_numbers<[1], [0], [0], [1], [0, 0, 1, 1], [], []>} : vector<128x256xf32>, vector<256x768xf32>, vector<128x768xf32> -> vector<128x768xf32>
    %c0_4 = arith.constant 0 : index
    %c0_5 = arith.constant 0 : index
    %c0_6 = arith.constant 0 : index
    %4 = vector.load %arg4[%c0_4, %c0_5, %c0_6] : memref<1x128x768xf32, #tpu.memory_space<vmem>>, vector<1x128x768xf32>
    %5 = vector.shape_cast %4 : vector<1x128x768xf32> to vector<128x768xf32>
    %6 = vector.shape_cast %3 : vector<128x768xf32> to vector<1x128x768xf32>
    tpu.vector_store %arg4[%c0_4, %c0_5, %c0_6], %6 {strides = array<i32>} : memref<1x128x768xf32, #tpu.memory_space<vmem>>, vector<1x128x768xf32>,
    return
  }
  func.func @transform_0(%arg0: i32, %arg1: i32) -> (i32, i32, i32) {
    %c0_i32 = arith.constant 0 : i32
    %c0_i32_0 = arith.constant 0 : i32
    return %arg0, %arg1, %c0_i32 : i32, i32, i32
  }
  func.func @transform_1(%arg0: i32, %arg1: i32) -> (i32, i32) {
    %c0_i32 = arith.constant 0 : i32
    %c0_i32_0 = arith.constant 0 : i32
    %c0_i32_1 = arith.constant 0 : i32
    return %c0_i32, %c0_i32_0 : i32, i32
  }
  func.func @transform_2(%arg0: i32, %arg1: i32) -> (i32, i32, i32) {
    %c0_i32 = arith.constant 0 : i32
    %c0_i32_0 = arith.constant 0 : i32
    return %arg0, %arg1, %c0_i32 : i32, i32, i32
  }
}

</mosaic_0001>

<bundles_post_ra>
// kernel: tpu_custom_call.1
= control target key start
LH: loop header
LB: loop body
LE: loop exit
PB: predicated region body
PF: predicated region fallthrough
CT: control target
= control target key end

     0   :  { %s1960_s0 = inlined_call_operand.hbm [shape: f32[2,256,256], index: 0, kind: input, shape index: {}]   ;;  %s1961_s1 = inlined_call_operand.hbm [shape: f32[256,768], index: 1, kind: input, shape index: {}]   ;;  %s1962_s2 = inlined_call_operand.hbm [shape: f32[2,256,768], index: 2, kind: output, shape index: {}]  }
   0x1   :  { %1967 = sst [smem:[#allocation14_spill]] %s1961_s1 }
   0x2   :  { %7 = vsyncpa [#allocation3], 0 }
   0x3   :  { %9 = vsyncpa [#allocation3 + $0x1], 0 }
   0x4   :  { %10 = vsyncpa [#allocation6], 0 }
   0x5   :  { %11 = vsyncpa [#allocation4], 0 }
   0x6   :  { %13 = vsyncpa [#allocation4 + $0x1], 0  ;;  %s1479_s9 = smov 0   ;;  %s1481_s10 = smov 0  }
   0x7   :  { %s1483_s11 = smov 0   ;;  %s1485_s12 = smov 0  }
   0x8   :  { %s1487_s13 = smov 0   ;;  %s1489_s14 = smov 0  }
   0x9   :  { %s1491_s15 = smov 0   ;;  %s1493_s16 = smov 0  }
   0xa LB: > { %1968 = sst [smem:[#allocation11_spill]] %s1445_s14  ;;  %s1118_s17 = sadd.s32 4294967295, %s1453_s16   ;;  %s1453_s16 = sphi %s1493_s16, %s19_s16   ;;  %s1449_s15 = sphi %s1491_s15, %s1989_s15   ;;  %s1445_s14 = sphi %s1489_s14, %s1984_s14   ;;  %s1441_s13 = sphi %s1487_s13, %s1988_s13   ;;  %s1437_s12 = sphi %s1485_s12, %s1983_s12   ;;  %s1433_s11 = sphi %s1483_s11, %s1987_s11   ;;  %s1429_s10 = sphi %s1481_s10, %s1986_s10   ;;  %s1425_s9 = sphi %s1479_s9, %s1985_s9  }
   0xb   : > { %s1119_s18 = sadd.s32 4294967294, %s1453_s16   ;;  %p53_p0 = scmp.ne.s32.totalorder %s1429_s10, %s1425_s9 }
   0xc   : > { %p1523_p1 = scmp.eq.s32.totalorder %s1118_s17, 0  ;;  %p1527_p2 = scmp.eq.s32.totalorder %s1118_s17, 3 }
   0xd   : > { %p106_p3 = scmp.eq.s32.totalorder %s1119_s18, 3  ;;  %p1120_p5 = scmp.ge.s32.totalorder %s1453_s16, 1 }
   0xe   : > { %p1533_p4 = por %p1523_p1, %p53_p0  ;;  %p113_p7 = scmp.lt.s32.totalorder %s1453_s16, 5 }
   0xf   : > { %p1538_p6 = por %p106_p3, %p53_p0  ;;  %s1455_s24 = smov [#allocation5]  }
  0x10   : > { %s1971_s21 = scalar_select %p1533_p4, 1, 0 }
  0x11   : > { %s1972_s22 = scalar_select %p1538_p6, 1, 0 }
  0x12   : > { %p1543_p8 = pnand %p1120_p5, %p113_p7  ;;  %s125_s25 = sshll.u32 %s1455_s24, 4  ;;  %s126_s25 = int_to_ptr.vmem [resolvable:$true] %s125_s25 }
  0x13   : > { %1973 = sst [smem:[#allocation12_spill]] %s1972_s22  ;;  %s1310_s26 = scalar_lea.vmem %s126_s25, 24576 }
  0x14   : > { %p1212_p9 = pneg %p1543_p8  ;;  %p1311_p12 = scmp.ne.s32.totalorder %s126_s25, %s1310_s26 }
  0x15   : > { %p1318_p3 = scmp.lt.s32.totalorder %s126_s25, %s126_s25  ;;  %p1319_p6 = scmp.lt.s32.totalorder %s1310_s26, %s1310_s26 }
  0x16   : > { %p1213_p10 = pnand %p1212_p9, %p1523_p1 }
  0x17   : > { %p1320_p4 = por %p1319_p6, %p1318_p3 }
  0x18   : > { %p1301_p11 = pneg %p1213_p10 }
  0x1a   : > { %p1313_p13 = pnand %p1311_p12, %p1301_p11 }
  0x1c   : > { %p1314_p0 = pneg %p1313_p13 }
  0x1e   : > { %p1321_p5 = pnand %p1320_p4, %p1314_p0 }
  0x20   : > { %1324 = shalt.err (!%p1321_p5)
}
  0x21   : > { %s1456_s27 = smov 768   ;;  %s1457_s28 = smov 48  }
  0x22   : > { %s1975_s1 = sld [smem:[#allocation14_spill]]  ;;  %s28_s3 = sadd.s32 1, %s1445_s14 }
  0x23   : > { %p29_p4 = scmp.ge.s32.totalorder %s28_s3, 2  ;;  %s31_s4 = sadd.s32 1, %s1449_s15 }
  0x24   : > { %s40_s5 = sadd.s32 1, %s1433_s11  ;;  %p47_p6 = scmp.ne.s32.totalorder %s1433_s11, %s1429_s10 }
  0x25   : > { %s1991_s3 = smov (%p29_p4, %s28_s3), 0  ;;  %s1993_s4 = smov (!%p29_p4, %s31_s4), %s1449_s15 }
  0x26   : > { %1976 = sst [smem:[#allocation13_spill]] %s1991_s3  ;;  %s36_s6 = ssub.s32 %s1445_s14, %s1991_s3 }
  0x27   : > { %p48_p7 = scmp.eq.s32.totalorder %s1453_s16, 0  ;;  %p33_p9 = scmp.ge.s32.totalorder %s1993_s4, 2 }
  0x28   : > { %1215 = dma.hbm_to_vmem [thread:$0]  (!%p1213_p10), %s1975_s1, 24576, %s126_s25, [#allocation6], %s1456_s27, %s1456_s27, %s1457_s28  }
  0x29   : > { %p1567_p11 = por %p1527_p2, %p47_p6  ;;  %p1571_p10 = por %p48_p7, %p47_p6 }
  0x2a   : > { %p1225_p12 = scmp.lt.s32.totalorder %s1453_s16, 4  ;;  %s1995_s4 = smov (%p33_p9, %s1993_s4), 0 }
  0x2b   : > { %s139_s17 = sand.u32 1, %s1433_s11   ;;  %s1136_s18 = sshll.u32 %s1445_s14, 5 }
  0x2c   : > { %s35_s24 = ssub.s32 %s1449_s15, %s1995_s4  ;;  %s1123_s26 = sshll.u32 %s139_s17, 8 }
  0x2d   : > { %s37_s25 = sor.u32 %s36_s6, %s35_s24  ;;  %s1126_s20 = sshll.u32 %s1449_s15, 6 }
  0x2e   : > { %p38_p13 = scmp.eq.s32.totalorder %s37_s25, 0  ;;  %s143_s27 = scalar_lea.vmem [#allocation2], %s1123_s26 }
  0x2f   : > { %s153_s28 = sshll.u32 %s143_s27, 4  ;;  %s150_s30 = sadd.s32 %s1136_s18, %s1126_s20  ;;  %s154_s28 = int_to_ptr.vmem [resolvable:$true] %s153_s28 }
  0x30   : > { %s1584_s29 = scalar_select %p38_p13, %s1433_s11, %s40_s5  }
  0x31   : > { %s1127_s1 = sshll.u32 %s150_s30, 7  ;;  %p1590_p2 = pnand %p1225_p12, %p1571_p10 }
  0x32   : > { %s152_s6 = scalar_lea.hbm %s1960_s0, %s1127_s1  ;;  %s140_s24 = scalar_lea.sflag [#allocation3], %s139_s17 }
  0x33   : > { %p1327_p0 = pneg %p1590_p2  ;;  %s1338_s25 = scalar_lea.vmem %s154_s28, 4096 }
  0x34   : > { %p1339_p3 = scmp.ne.s32.totalorder %s154_s28, %s1338_s25  ;;  %s1458_s5 = smov [#allocation2]  }
  0x35   : > { %s1343_s18 = sshll.u32 %s1458_s5, 4  ;;  %s1344_s18 = int_to_ptr.vmem [resolvable:$false] %s1343_s18 }
  0x36   : > { %p1341_p5 = pnand %p1339_p3, %p1327_p0  ;;  %s1345_s8 = scalar_lea.vmem %s1344_s18, 8192 }
  0x37   : > { %p1346_p6 = scmp.lt.s32.totalorder %s154_s28, %s1344_s18  ;;  %p1347_p7 = scmp.lt.s32.totalorder %s1345_s8, %s1338_s25 }
  0x38   : > { %p1342_p4 = pneg %p1341_p5 }
  0x39   : > { %p1348_p9 = por %p1347_p7, %p1346_p6 }
  0x3b   : > { %p1349_p10 = pnand %p1348_p9, %p1342_p4 }
  0x3d   : > { %1352 = shalt.err (!%p1349_p10)
}
  0x3e   : > { %s1459_s26 = smov 256   ;;  %s1460_s14 = smov 16  }
  0x3f   : > { %1219 = dma.hbm_to_vmem [thread:$0]  (!%p1590_p2), %s152_s6, 4096, %s154_s28, %s140_s24, %s1459_s26, %s1459_s26, %s1460_s14  }
  0x40   : > { %165 = sbr.rel (%p1543_p8) target bundleno = 471 (0x1d7), region = 28  ;;  %s1604_s1 = sand.u32 (!%p1543_p8), 1, %s1429_s10  }
  0x41   : > { %s1129_s22 = sshll.u32 (!%p1543_p8), %s1604_s1, 8  ;;  %s168_s17 = scalar_lea.sflag (!%p1543_p8), [#allocation3], %s1604_s1 }
  0x42   : > { %s1608_s20 = scalar_lea.vmem (!%p1543_p8), [#allocation2], %s1129_s22  ;;  %p1980_p12 = scmp.ne.s32.totalorder (!%p1543_p8), %s1971_s21, 0 }
  0x45   : > { %1412 = dma.done.wait (%p1980_p12), %s168_s17, 4096  }
  0x46   : > { %1414 = vsyncadd (%p1980_p12), %s168_s17, 4294963200 }
  0x47   : > { %1416 = dma.done.wait (%p1523_p1), [#allocation6], 24576  }
  0x48   : > { %1418 = vsyncadd (%p1523_p1), [#allocation6], 4294942720  ;;  %v321_v0 = vld [vmem:[#allocation5 + $0x2d8] sm:$0xff]  ;;  %v323_v1 = vld [vmem:[#allocation5 + $0x2e8] sm:$0xff]  ;;  %s1201_s19 = smul.u32 768, %s1604_s1  ;;  %s1002_s24 = scalar_lea.sflag [#allocation4], %s1604_s1 }
  0x49   : > { %v320_v2 = vld [vmem:[#allocation5 + $0x2d0] sm:$0xff]  ;;  %422 = vmatprep.subr.mxu0 %v321_v0  ;;  %583 = vmatprep.subr.mxu1 %v323_v1  ;;  %v322_v3 = vld [vmem:[#allocation5 + $0x2e0] sm:$0xff]  ;;  %v315_v4 = vld [vmem:[#allocation5 + $0x2a8] sm:$0xff]  ;;  %s1202_s23 = smul.u32 96, %s1437_s12  ;;  %s1461_s5 = smov [#allocation7]  }
  0x4a   : > { %v317_v5 = vld [vmem:[#allocation5 + $0x2b8] sm:$0xff]  ;;  %423 = vmatpush1.msra.mxu0 %v320_v2  ;;  %584 = vmatpush1.msra.mxu1 %v322_v3  ;;  %v314_v6 = vld [vmem:[#allocation5 + $0x2a0] sm:$0xff]  ;;  %v316_v7 = vld [vmem:[#allocation5 + $0x2b0] sm:$0xff]  ;;  %s1801_s21 = scalar_lea.vmem [#allocation7], %s1201_s19  ;;  %s1203_s3 = smul.u32 192, %s1441_s13 }
  0x4b   : > { %v309_v8 = vld [vmem:[#allocation5 + $0x278] sm:$0xff]  ;;  %424 = vmatprep.subr.mxu0 %v315_v4  ;;  %585 = vmatprep.subr.mxu1 %v317_v5  ;;  %v311_v9 = vld [vmem:[#allocation5 + $0x288] sm:$0xff]  ;;  %v308_v10 = vld [vmem:[#allocation5 + $0x270] sm:$0xff]  ;;  %s1018_s13 = sshll.u32 %s1801_s21, 4  ;;  %s1357_s18 = sshll.u32 %s1461_s5, 4  ;;  %s1903_s13 = int_to_ptr.vmem [resolvable:$true] %s1018_s13  ;;  %s1358_s18 = int_to_ptr.vmem [resolvable:$false] %s1357_s18 }
  0x4c   : > { %v310_v11 = vld [vmem:[#allocation5 + $0x280] sm:$0xff]  ;;  %425 = vmatpush1.msra.mxu0 %v314_v6  ;;  %586 = vmatpush1.msra.mxu1 %v316_v7  ;;  %v303_v12 = vld [vmem:[#allocation5 + $0x248] sm:$0xff]  ;;  %v305_v13 = vld [vmem:[#allocation5 + $0x258] sm:$0xff]  ;;  %s1015_s27 = sadd.s32 %s1203_s3, %s1202_s23  ;;  %s1353_s25 = scalar_lea.vmem %s1903_s13, 12288 }
  0x4d   : > { %426 = vmatprep.subr.mxu0 %v309_v8  ;;  %587 = vmatprep.subr.mxu1 %v311_v9  ;;  %v302_v14 = vld [vmem:[#allocation5 + $0x240] sm:$0xff]  ;;  %v304_v15 = vld [vmem:[#allocation5 + $0x250] sm:$0xff]  ;;  %v297_v16 = vld [vmem:[#allocation5 + $0x218] sm:$0xff]  ;;  %s1133_s12 = sshll.u32 %s1015_s27, 7  ;;  %p1354_p1 = scmp.ne.s32.totalorder %s1903_s13, %s1353_s25 }
  0x4e   : > { %427 = vmatpush1.msra.mxu0 %v308_v10  ;;  %588 = vmatpush1.msra.mxu1 %v310_v11  ;;  %v299_v17 = vld [vmem:[#allocation5 + $0x228] sm:$0xff]  ;;  %v296_v18 = vld [vmem:[#allocation5 + $0x210] sm:$0xff]  ;;  %v298_v19 = vld [vmem:[#allocation5 + $0x220] sm:$0xff]  ;;  %s1901_s6 = scalar_lea.hbm %s1962_s2, %s1133_s12  ;;  %s1359_s8 = scalar_lea.vmem %s1358_s18, 24576 }
  0x4f   : > { %428 = vmatprep.subr.mxu0 %v303_v12  ;;  %589 = vmatprep.subr.mxu1 %v305_v13  ;;  %v291_v20 = vld [vmem:[#allocation5 + $0x1e8] sm:$0xff]  ;;  %v293_v21 = vld [vmem:[#allocation5 + $0x1f8] sm:$0xff]  ;;  %v290_v22 = vld [vmem:[#allocation5 + $0x1e0] sm:$0xff]  ;;  %p1355_p8 = pnand %p1354_p1, %p1567_p11  ;;  %p1360_p2 = scmp.lt.s32.totalorder %s1903_s13, %s1358_s18 }
  0x50   : > { %429 = vmatpush1.msra.mxu0 %v302_v14  ;;  %590 = vmatpush1.msra.mxu1 %v304_v15  ;;  %v292_v23 = vld [vmem:[#allocation5 + $0x1f0] sm:$0xff]  ;;  %v285_v24 = vld [vmem:[#allocation5 + $0x1b8] sm:$0xff]  ;;  %v287_v25 = vld [vmem:[#allocation5 + $0x1c8] sm:$0xff]  ;;  %p1361_p0 = scmp.lt.s32.totalorder %s1359_s8, %s1353_s25 }
  0x51   : > { %430 = vmatprep.subr.mxu0 %v297_v16  ;;  %591 = vmatprep.subr.mxu1 %v299_v17  ;;  %v284_v26 = vld [vmem:[#allocation5 + $0x1b0] sm:$0xff]  ;;  %v286_v27 = vld [vmem:[#allocation5 + $0x1c0] sm:$0xff]  ;;  %v279_v28 = vld [vmem:[#allocation5 + $0x188] sm:$0xff]  ;;  %p1356_p13 = pneg %p1355_p8 }
  0x52   : > { %431 = vmatpush1.msra.mxu0 %v296_v18  ;;  %592 = vmatpush1.msra.mxu1 %v298_v19  ;;  %v281_v29 = vld [vmem:[#allocation5 + $0x198] sm:$0xff]  ;;  %v278_v30 = vld [vmem:[#allocation5 + $0x180] sm:$0xff]  ;;  %v280_v31 = vld [vmem:[#allocation5 + $0x190] sm:$0xff]  ;;  %p1362_p3 = por %p1361_p0, %p1360_p2 }
  0x53   : > { %432 = vmatprep.subr.mxu0 %v291_v20  ;;  %593 = vmatprep.subr.mxu1 %v293_v21  ;;  %v273_v32 = vld [vmem:[#allocation5 + $0x158] sm:$0xff]  ;;  %v275_v33 = vld [vmem:[#allocation5 + $0x168] sm:$0xff]  ;;  %v272_v34 = vld [vmem:[#allocation5 + $0x150] sm:$0xff] }
  0x54   : > { %433 = vmatpush1.msra.mxu0 %v290_v22  ;;  %594 = vmatpush1.msra.mxu1 %v292_v23  ;;  %v274_v35 = vld [vmem:[#allocation5 + $0x160] sm:$0xff]  ;;  %v267_v36 = vld [vmem:[#allocation5 + $0x128] sm:$0xff]  ;;  %v269_v37 = vld [vmem:[#allocation5 + $0x138] sm:$0xff]  ;;  %p1363_p5 = pnand %p1362_p3, %p1356_p13 }
  0x55   : > { %434 = vmatprep.subr.mxu0 %v285_v24  ;;  %595 = vmatprep.subr.mxu1 %v287_v25  ;;  %v266_v38 = vld [vmem:[#allocation5 + $0x120] sm:$0xff]  ;;  %v268_v39 = vld [vmem:[#allocation5 + $0x130] sm:$0xff]  ;;  %v261_v40 = vld [vmem:[#allocation5 + $0xf8] sm:$0xff] }
  0x56   : > { %435 = vmatpush1.msra.mxu0 %v284_v26  ;;  %596 = vmatpush1.msra.mxu1 %v286_v27  ;;  %v263_v41 = vld [vmem:[#allocation5 + $0x108] sm:$0xff]  ;;  %v260_v42 = vld [vmem:[#allocation5 + $0xf0] sm:$0xff]  ;;  %v262_v43 = vld [vmem:[#allocation5 + $0x100] sm:$0xff] }
  0x57   : > { %436 = vmatprep.subr.mxu0 %v279_v28  ;;  %597 = vmatprep.subr.mxu1 %v281_v29  ;;  %v255_v44 = vld [vmem:[#allocation5 + $0xc8] sm:$0xff]  ;;  %v257_v45 = vld [vmem:[#allocation5 + $0xd8] sm:$0xff]  ;;  %v254_v46 = vld [vmem:[#allocation5 + $0xc0] sm:$0xff] }
  0x58   : > { %437 = vmatpush1.msra.mxu0 %v278_v30  ;;  %598 = vmatpush1.msra.mxu1 %v280_v31  ;;  %v256_v47 = vld [vmem:[#allocation5 + $0xd0] sm:$0xff]  ;;  %v249_v48 = vld [vmem:[#allocation5 + $0x98] sm:$0xff]  ;;  %v251_v49 = vld [vmem:[#allocation5 + $0xa8] sm:$0xff] }
  0x59   : > { %438 = vmatprep.subr.mxu0 %v273_v32  ;;  %599 = vmatprep.subr.mxu1 %v275_v33  ;;  %v248_v50 = vld [vmem:[#allocation5 + $0x90] sm:$0xff]  ;;  %v250_v51 = vld [vmem:[#allocation5 + $0xa0] sm:$0xff]  ;;  %v243_v52 = vld [vmem:[#allocation5 + $0x68] sm:$0xff] }
  0x5a   : > { %439 = vmatpush1.msra.mxu0 %v272_v34  ;;  %600 = vmatpush1.msra.mxu1 %v274_v35  ;;  %v245_v53 = vld [vmem:[#allocation5 + $0x78] sm:$0xff]  ;;  %v242_v54 = vld [vmem:[#allocation5 + $0x60] sm:$0xff]  ;;  %v244_v55 = vld [vmem:[#allocation5 + $0x70] sm:$0xff] }
  0x5b   : > { %440 = vmatprep.subr.mxu0 %v267_v36  ;;  %601 = vmatprep.subr.mxu1 %v269_v37  ;;  %v237_v56 = vld [vmem:[#allocation5 + $0x38] sm:$0xff]  ;;  %v239_v57 = vld [vmem:[#allocation5 + $0x48] sm:$0xff]  ;;  %v236_v58 = vld [vmem:[#allocation5 + $0x30] sm:$0xff] }
  0x5c   : > { %441 = vmatpush1.msra.mxu0 %v266_v38  ;;  %602 = vmatpush1.msra.mxu1 %v268_v39  ;;  %v238_v59 = vld [vmem:[#allocation5 + $0x40] sm:$0xff]  ;;  %v231_v60 = vld [vmem:[#allocation5 + $0x8] sm:$0xff]  ;;  %v233_v61 = vld [vmem:[#allocation5 + $0x18] sm:$0xff] }
  0x5d   : > { %442 = vmatprep.subr.mxu0 %v261_v40  ;;  %603 = vmatprep.subr.mxu1 %v263_v41  ;;  %v230_v62 = vld [vmem:[#allocation5] sm:$0xff]  ;;  %v232_v63 = vld [vmem:[#allocation5 + $0x10] sm:$0xff]  ;;  %v417_v0 = vld [vmem:[#allocation5 + $0x5d8] sm:$0xff] }
  0x5e   : > { %443 = vmatpush1.msra.mxu0 %v260_v42  ;;  %604 = vmatpush1.msra.mxu1 %v262_v43  ;;  %v419_v1 = vld [vmem:[#allocation5 + $0x5e8] sm:$0xff]  ;;  %v416_v2 = vld [vmem:[#allocation5 + $0x5d0] sm:$0xff]  ;;  %v418_v3 = vld [vmem:[#allocation5 + $0x5e0] sm:$0xff] }
  0x5f   : > { %444 = vmatprep.subr.mxu0 %v255_v44  ;;  %605 = vmatprep.subr.mxu1 %v257_v45  ;;  %v411_v4 = vld [vmem:[#allocation5 + $0x5a8] sm:$0xff]  ;;  %v413_v5 = vld [vmem:[#allocation5 + $0x5b8] sm:$0xff]  ;;  %v410_v6 = vld [vmem:[#allocation5 + $0x5a0] sm:$0xff] }
  0x60   : > { %445 = vmatpush1.msra.mxu0 %v254_v46  ;;  %606 = vmatpush1.msra.mxu1 %v256_v47  ;;  %v412_v7 = vld [vmem:[#allocation5 + $0x5b0] sm:$0xff]  ;;  %v405_v8 = vld [vmem:[#allocation5 + $0x578] sm:$0xff]  ;;  %v407_v9 = vld [vmem:[#allocation5 + $0x588] sm:$0xff] }
  0x61   : > { %446 = vmatprep.subr.mxu0 %v249_v48  ;;  %607 = vmatprep.subr.mxu1 %v251_v49  ;;  %v404_v10 = vld [vmem:[#allocation5 + $0x570] sm:$0xff]  ;;  %v406_v11 = vld [vmem:[#allocation5 + $0x580] sm:$0xff]  ;;  %v399_v12 = vld [vmem:[#allocation5 + $0x548] sm:$0xff] }
  0x62   : > { %447 = vmatpush1.msra.mxu0 %v248_v50  ;;  %608 = vmatpush1.msra.mxu1 %v250_v51  ;;  %v401_v13 = vld [vmem:[#allocation5 + $0x558] sm:$0xff]  ;;  %v398_v14 = vld [vmem:[#allocation5 + $0x540] sm:$0xff]  ;;  %v400_v15 = vld [vmem:[#allocation5 + $0x550] sm:$0xff] }
  0x63   : > { %448 = vmatprep.subr.mxu0 %v243_v52  ;;  %609 = vmatprep.subr.mxu1 %v245_v53  ;;  %v393_v16 = vld [vmem:[#allocation5 + $0x518] sm:$0xff]  ;;  %v395_v17 = vld [vmem:[#allocation5 + $0x528] sm:$0xff]  ;;  %v392_v18 = vld [vmem:[#allocation5 + $0x510] sm:$0xff] }
  0x64   : > { %449 = vmatpush1.msra.mxu0 %v242_v54  ;;  %610 = vmatpush1.msra.mxu1 %v244_v55  ;;  %v394_v19 = vld [vmem:[#allocation5 + $0x520] sm:$0xff]  ;;  %v387_v20 = vld [vmem:[#allocation5 + $0x4e8] sm:$0xff]  ;;  %v389_v21 = vld [vmem:[#allocation5 + $0x4f8] sm:$0xff] }
  0x65   : > { %450 = vmatprep.subr.mxu0 %v237_v56  ;;  %611 = vmatprep.subr.mxu1 %v239_v57  ;;  %v386_v22 = vld [vmem:[#allocation5 + $0x4e0] sm:$0xff]  ;;  %v388_v23 = vld [vmem:[#allocation5 + $0x4f0] sm:$0xff]  ;;  %v381_v24 = vld [vmem:[#allocation5 + $0x4b8] sm:$0xff] }
  0x66   : > { %451 = vmatpush1.msra.mxu0 %v236_v58  ;;  %612 = vmatpush1.msra.mxu1 %v238_v59  ;;  %v383_v25 = vld [vmem:[#allocation5 + $0x4c8] sm:$0xff]  ;;  %v380_v26 = vld [vmem:[#allocation5 + $0x4b0] sm:$0xff]  ;;  %v382_v27 = vld [vmem:[#allocation5 + $0x4c0] sm:$0xff] }
  0x67   : > { %452 = vmatprep.subr.mxu0 %v231_v60  ;;  %613 = vmatprep.subr.mxu1 %v233_v61  ;;  %v375_v28 = vld [vmem:[#allocation5 + $0x488] sm:$0xff]  ;;  %v377_v29 = vld [vmem:[#allocation5 + $0x498] sm:$0xff]  ;;  %v374_v30 = vld [vmem:[#allocation5 + $0x480] sm:$0xff] }
  0x68   : > { %453 = vmatpush1.msra.mxu0 %v230_v62  ;;  %614 = vmatpush1.msra.mxu1 %v232_v63  ;;  %v376_v31 = vld [vmem:[#allocation5 + $0x490] sm:$0xff]  ;;  %v369_v32 = vld [vmem:[#allocation5 + $0x458] sm:$0xff]  ;;  %v371_v33 = vld [vmem:[#allocation5 + $0x468] sm:$0xff] }
  0x69   : > { %454 = vmatprep.subr.mxu0 %v417_v0  ;;  %615 = vmatprep.subr.mxu1 %v419_v1  ;;  %v368_v34 = vld [vmem:[#allocation5 + $0x450] sm:$0xff]  ;;  %v370_v35 = vld [vmem:[#allocation5 + $0x460] sm:$0xff]  ;;  %v363_v36 = vld [vmem:[#allocation5 + $0x428] sm:$0xff] }
  0x6a   : > { %455 = vmatpush2.msra.mxu0 %v416_v2  ;;  %616 = vmatpush2.msra.mxu1 %v418_v3  ;;  %v365_v37 = vld [vmem:[#allocation5 + $0x438] sm:$0xff]  ;;  %v362_v38 = vld [vmem:[#allocation5 + $0x420] sm:$0xff]  ;;  %v364_v39 = vld [vmem:[#allocation5 + $0x430] sm:$0xff] }
  0x6b   : > { %456 = vmatprep.subr.mxu0 %v411_v4  ;;  %617 = vmatprep.subr.mxu1 %v413_v5  ;;  %v357_v40 = vld [vmem:[#allocation5 + $0x3f8] sm:$0xff]  ;;  %v359_v41 = vld [vmem:[#allocation5 + $0x408] sm:$0xff]  ;;  %v356_v42 = vld [vmem:[#allocation5 + $0x3f0] sm:$0xff] }
  0x6c   : > { %457 = vmatpush2.msra.mxu0 %v410_v6  ;;  %618 = vmatpush2.msra.mxu1 %v412_v7  ;;  %v358_v43 = vld [vmem:[#allocation5 + $0x400] sm:$0xff]  ;;  %v351_v44 = vld [vmem:[#allocation5 + $0x3c8] sm:$0xff]  ;;  %v353_v45 = vld [vmem:[#allocation5 + $0x3d8] sm:$0xff] }
  0x6d   : > { %458 = vmatprep.subr.mxu0 %v405_v8  ;;  %619 = vmatprep.subr.mxu1 %v407_v9  ;;  %v350_v46 = vld [vmem:[#allocation5 + $0x3c0] sm:$0xff]  ;;  %v352_v47 = vld [vmem:[#allocation5 + $0x3d0] sm:$0xff]  ;;  %v345_v48 = vld [vmem:[#allocation5 + $0x398] sm:$0xff] }
  0x6e   : > { %459 = vmatpush2.msra.mxu0 %v404_v10  ;;  %620 = vmatpush2.msra.mxu1 %v406_v11  ;;  %v347_v49 = vld [vmem:[#allocation5 + $0x3a8] sm:$0xff]  ;;  %v344_v50 = vld [vmem:[#allocation5 + $0x390] sm:$0xff]  ;;  %v346_v51 = vld [vmem:[#allocation5 + $0x3a0] sm:$0xff] }
  0x6f   : > { %460 = vmatprep.subr.mxu0 %v399_v12  ;;  %621 = vmatprep.subr.mxu1 %v401_v13  ;;  %v339_v52 = vld [vmem:[#allocation5 + $0x368] sm:$0xff]  ;;  %v341_v53 = vld [vmem:[#allocation5 + $0x378] sm:$0xff]  ;;  %v338_v54 = vld [vmem:[#allocation5 + $0x360] sm:$0xff] }
  0x70   : > { %461 = vmatpush2.msra.mxu0 %v398_v14  ;;  %622 = vmatpush2.msra.mxu1 %v400_v15  ;;  %v340_v55 = vld [vmem:[#allocation5 + $0x370] sm:$0xff]  ;;  %v333_v56 = vld [vmem:[#allocation5 + $0x338] sm:$0xff]  ;;  %v335_v57 = vld [vmem:[#allocation5 + $0x348] sm:$0xff] }
  0x71   : > { %462 = vmatprep.subr.mxu0 %v393_v16  ;;  %623 = vmatprep.subr.mxu1 %v395_v17  ;;  %v332_v58 = vld [vmem:[#allocation5 + $0x330] sm:$0xff]  ;;  %v334_v59 = vld [vmem:[#allocation5 + $0x340] sm:$0xff]  ;;  %v327_v60 = vld [vmem:[#allocation5 + $0x308] sm:$0xff] }
  0x72   : > { %463 = vmatpush2.msra.mxu0 %v392_v18  ;;  %624 = vmatpush2.msra.mxu1 %v394_v19  ;;  %v329_v61 = vld [vmem:[#allocation5 + $0x318] sm:$0xff]  ;;  %v326_v62 = vld [vmem:[#allocation5 + $0x300] sm:$0xff]  ;;  %v1619_v63 = vld [vmem:[%s1608_s20 + $0x8] sm:$0xff] }
  0x73   : > { %464 = vmatprep.subr.mxu0 %v387_v20  ;;  %625 = vmatprep.subr.mxu1 %v389_v21  ;;  %v328_v0 = vld [vmem:[#allocation5 + $0x310] sm:$0xff]  ;;  %v1622_v1 = vld [vmem:[%s1608_s20] sm:$0xff]  ;;  %v325_v2 = vld [vmem:[#allocation5 + $0x2f8] sm:$0xff] }
  0x74   : > { %465 = vmatpush2.msra.mxu0 %v386_v22  ;;  %626 = vmatpush2.msra.mxu1 %v388_v23  ;;  %v324_v3 = vld [vmem:[#allocation5 + $0x2f0] sm:$0xff]  ;;  %v319_v4 = vld [vmem:[#allocation5 + $0x2c8] sm:$0xff]  ;;  %v1629_v5 = vld [vmem:[%s1608_s20 + $0x18] sm:$0xff] }
  0x75   : > { %466 = vmatprep.subr.mxu0 %v381_v24  ;;  %627 = vmatprep.subr.mxu1 %v383_v25  ;;  %v318_v6 = vld [vmem:[#allocation5 + $0x2c0] sm:$0xff]  ;;  %v1632_v7 = vld [vmem:[%s1608_s20 + $0x10] sm:$0xff]  ;;  %v313_v8 = vld [vmem:[#allocation5 + $0x298] sm:$0xff] }
  0x76   : > { %467 = vmatpush2.msra.mxu0 %v380_v26  ;;  %628 = vmatpush2.msra.mxu1 %v382_v27  ;;  %v312_v9 = vld [vmem:[#allocation5 + $0x290] sm:$0xff]  ;;  %v307_v10 = vld [vmem:[#allocation5 + $0x268] sm:$0xff]  ;;  %v306_v12 = vld [vmem:[#allocation5 + $0x260] sm:$0xff] }
  0x77   : > { %468 = vmatprep.subr.mxu0 %v375_v28  ;;  %629 = vmatprep.subr.mxu1 %v377_v29  ;;  %v1639_v11 = vld [vmem:[%s1608_s20 + $0x28] sm:$0xff]  ;;  %v1642_v13 = vld [vmem:[%s1608_s20 + $0x20] sm:$0xff]  ;;  %v301_v14 = vld [vmem:[#allocation5 + $0x238] sm:$0xff] }
  0x78   : > { %469 = vmatpush2.msra.mxu0 %v374_v30  ;;  %630 = vmatpush2.msra.mxu1 %v376_v31  ;;  %v300_v15 = vld [vmem:[#allocation5 + $0x230] sm:$0xff]  ;;  %v295_v16 = vld [vmem:[#allocation5 + $0x208] sm:$0xff]  ;;  %v1649_v17 = vld [vmem:[%s1608_s20 + $0x38] sm:$0xff] }
  0x79   : > { %470 = vmatprep.subr.mxu0 %v369_v32  ;;  %631 = vmatprep.subr.mxu1 %v371_v33  ;;  %v294_v18 = vld [vmem:[#allocation5 + $0x200] sm:$0xff]  ;;  %v1652_v19 = vld [vmem:[%s1608_s20 + $0x30] sm:$0xff]  ;;  %v289_v20 = vld [vmem:[#allocation5 + $0x1d8] sm:$0xff] }
  0x7a   : > { %471 = vmatpush2.msra.mxu0 %v368_v34  ;;  %632 = vmatpush2.msra.mxu1 %v370_v35  ;;  %v288_v21 = vld [vmem:[#allocation5 + $0x1d0] sm:$0xff]  ;;  %v283_v22 = vld [vmem:[#allocation5 + $0x1a8] sm:$0xff]  ;;  %v282_v24 = vld [vmem:[#allocation5 + $0x1a0] sm:$0xff] }
  0x7b   : > { %472 = vmatprep.subr.mxu0 %v363_v36  ;;  %633 = vmatprep.subr.mxu1 %v365_v37  ;;  %v1659_v23 = vld [vmem:[%s1608_s20 + $0x48] sm:$0xff]  ;;  %v1662_v25 = vld [vmem:[%s1608_s20 + $0x40] sm:$0xff]  ;;  %v277_v26 = vld [vmem:[#allocation5 + $0x178] sm:$0xff] }
  0x7c   : > { %473 = vmatpush2.msra.mxu0 %v362_v38  ;;  %634 = vmatpush2.msra.mxu1 %v364_v39  ;;  %v276_v27 = vld [vmem:[#allocation5 + $0x170] sm:$0xff]  ;;  %v271_v28 = vld [vmem:[#allocation5 + $0x148] sm:$0xff]  ;;  %v1669_v29 = vld [vmem:[%s1608_s20 + $0x58] sm:$0xff] }
  0x7d   : > { %474 = vmatprep.subr.mxu0 %v357_v40  ;;  %635 = vmatprep.subr.mxu1 %v359_v41  ;;  %v270_v30 = vld [vmem:[#allocation5 + $0x140] sm:$0xff]  ;;  %v1672_v31 = vld [vmem:[%s1608_s20 + $0x50] sm:$0xff]  ;;  %v265_v32 = vld [vmem:[#allocation5 + $0x118] sm:$0xff] }
  0x7e   : > { %475 = vmatpush2.msra.mxu0 %v356_v42  ;;  %636 = vmatpush2.msra.mxu1 %v358_v43  ;;  %v264_v33 = vld [vmem:[#allocation5 + $0x110] sm:$0xff]  ;;  %v259_v34 = vld [vmem:[#allocation5 + $0xe8] sm:$0xff]  ;;  %v258_v36 = vld [vmem:[#allocation5 + $0xe0] sm:$0xff] }
  0x7f   : > { %476 = vmatprep.subr.mxu0 %v351_v44  ;;  %637 = vmatprep.subr.mxu1 %v353_v45  ;;  %v1679_v35 = vld [vmem:[%s1608_s20 + $0x68] sm:$0xff]  ;;  %v1682_v37 = vld [vmem:[%s1608_s20 + $0x60] sm:$0xff]  ;;  %v253_v38 = vld [vmem:[#allocation5 + $0xb8] sm:$0xff] }
  0x80   : > { %477 = vmatpush2.msra.mxu0 %v350_v46  ;;  %638 = vmatpush2.msra.mxu1 %v352_v47  ;;  %v252_v39 = vld [vmem:[#allocation5 + $0xb0] sm:$0xff]  ;;  %v247_v40 = vld [vmem:[#allocation5 + $0x88] sm:$0xff]  ;;  %v1689_v41 = vld [vmem:[%s1608_s20 + $0x78] sm:$0xff] }
  0x81   : > { %478 = vmatprep.subr.mxu0 %v345_v48  ;;  %639 = vmatprep.subr.mxu1 %v347_v49  ;;  %v246_v42 = vld [vmem:[#allocation5 + $0x80] sm:$0xff]  ;;  %v1692_v43 = vld [vmem:[%s1608_s20 + $0x70] sm:$0xff]  ;;  %v241_v44 = vld [vmem:[#allocation5 + $0x58] sm:$0xff] }
  0x82   : > { %479 = vmatpush2.msra.mxu0 %v344_v50  ;;  %640 = vmatpush2.msra.mxu1 %v346_v51  ;;  %v240_v45 = vld [vmem:[#allocation5 + $0x50] sm:$0xff]  ;;  %v235_v46 = vld [vmem:[#allocation5 + $0x28] sm:$0xff]  ;;  %v234_v48 = vld [vmem:[#allocation5 + $0x20] sm:$0xff] }
  0x83   : > { %480 = vmatprep.subr.mxu0 %v339_v52  ;;  %641 = vmatprep.subr.mxu1 %v341_v53  ;;  %v1699_v47 = vld [vmem:[%s1608_s20 + $0x88] sm:$0xff]  ;;  %v1702_v49 = vld [vmem:[%s1608_s20 + $0x80] sm:$0xff]  ;;  %v421_v50 = vld [vmem:[#allocation5 + $0x5f8] sm:$0xff] }
  0x84   : > { %481 = vmatpush2.msra.mxu0 %v338_v54  ;;  %642 = vmatpush2.msra.mxu1 %v340_v55  ;;  %v420_v51 = vld [vmem:[#allocation5 + $0x5f0] sm:$0xff]  ;;  %v415_v52 = vld [vmem:[#allocation5 + $0x5c8] sm:$0xff]  ;;  %v1709_v53 = vld [vmem:[%s1608_s20 + $0x98] sm:$0xff] }
  0x85   : > { %482 = vmatprep.subr.mxu0 %v333_v56  ;;  %643 = vmatprep.subr.mxu1 %v335_v57  ;;  %v414_v54 = vld [vmem:[#allocation5 + $0x5c0] sm:$0xff]  ;;  %v1712_v55 = vld [vmem:[%s1608_s20 + $0x90] sm:$0xff]  ;;  %v409_v56 = vld [vmem:[#allocation5 + $0x598] sm:$0xff] }
  0x86   : > { %483 = vmatpush2.msra.mxu0 %v332_v58  ;;  %644 = vmatpush2.msra.mxu1 %v334_v59  ;;  %v408_v57 = vld [vmem:[#allocation5 + $0x590] sm:$0xff]  ;;  %v403_v58 = vld [vmem:[#allocation5 + $0x568] sm:$0xff] }
  0x87   : > { %484 = vmatprep.subr.mxu0 %v327_v60  ;;  %645 = vmatprep.subr.mxu1 %v329_v61  ;;  %v1719_v59 = vld [vmem:[%s1608_s20 + $0xa8] sm:$0xff]  ;;  %v402_v60 = vld [vmem:[#allocation5 + $0x560] sm:$0xff] }
  0x88   : > { %485 = vmatpush2.msra.mxu0 %v326_v62  ;;  %486 = vmatprep.mubr.f32.mxu0 %v1619_v63  ;;  %v1722_v61 = vld [vmem:[%s1608_s20 + $0xa0] sm:$0xff]  ;;  %v397_v62 = vld [vmem:[#allocation5 + $0x538] sm:$0xff] }
  0x89   : > { %646 = vmatpush2.msra.mxu1 %v328_v0  ;;  %647 = vmatprep.mubr.f32.mxu1 %v1619_v63  ;;  %v396_v0 = vld [vmem:[#allocation5 + $0x530] sm:$0xff] }
  0x8a   : > { %487 = vmatmul.mubr.f32.vlgmr.msra.gmra.mxu0 %v1622_v1  ;;  %648 = vmatmul.mubr.f32.vlgmr.msra.gmra.mxu1 %v1622_v1 }
  0x8b   : > { %744 = vmatprep.subr.mxu0 %v325_v2  ;;  %1137 = vmatprep.subr.mxu1 %v325_v2  ;;  %v391_v2 = vld [vmem:[#allocation5 + $0x508] sm:$0xff] }
  0x8c   : > { %745 = vmatpush1.msra.mxu0 %v324_v3  ;;  %1169 = vmatpush1.msra.mxu1 %v324_v3  ;;  %v1729_v3 = vld [vmem:[%s1608_s20 + $0xb8] sm:$0xff] }
  0x8d   : > { %746 = vmatprep.subr.mxu0 %v319_v4  ;;  %1138 = vmatprep.subr.mxu1 %v319_v4  ;;  %v390_v4 = vld [vmem:[#allocation5 + $0x500] sm:$0xff] }
  0x8e   : > { %492 = vmatprep.mubr.f32.mxu0 %v1629_v5  ;;  %653 = vmatprep.mubr.f32.mxu1 %v1629_v5 }
  0x8f   : > { %747 = vmatpush1.msra.mxu0 %v318_v6  ;;  %1170 = vmatpush1.msra.mxu1 %v318_v6  ;;  %v1732_v6 = vld [vmem:[%s1608_s20 + $0xb0] sm:$0xff] }
  0x90   : > { %493 = vmatmul.mubr.f32.gmra.mxu0 %v1632_v7  ;;  %654 = vmatmul.mubr.f32.gmra.mxu1 %v1632_v7 }
  0x91   : > { %748 = vmatprep.subr.mxu0 %v313_v8  ;;  %1139 = vmatprep.subr.mxu1 %v313_v8  ;;  %v385_v8 = vld [vmem:[#allocation5 + $0x4d8] sm:$0xff] }
  0x92   : > { %749 = vmatpush1.msra.mxu0 %v312_v9  ;;  %1171 = vmatpush1.msra.mxu1 %v312_v9  ;;  %v384_v9 = vld [vmem:[#allocation5 + $0x4d0] sm:$0xff] }
  0x93   : > { %750 = vmatprep.subr.mxu0 %v307_v10  ;;  %1140 = vmatprep.subr.mxu1 %v307_v10  ;;  %v379_v10 = vld [vmem:[#allocation5 + $0x4a8] sm:$0xff] }
  0x94   : > { %498 = vmatprep.mubr.f32.mxu0 %v1639_v11  ;;  %659 = vmatprep.mubr.f32.mxu1 %v1639_v11 }
  0x95   : > { %751 = vmatpush1.msra.mxu0 %v306_v12  ;;  %1172 = vmatpush1.msra.mxu1 %v306_v12  ;;  %v1739_v12 = vld [vmem:[%s1608_s20 + $0xc8] sm:$0xff] }
  0x96   : > { %499 = vmatmul.mubr.f32.gmra.mxu0 %v1642_v13  ;;  %660 = vmatmul.mubr.f32.gmra.mxu1 %v1642_v13 }
  0x97   : > { %752 = vmatprep.subr.mxu0 %v301_v14  ;;  %1141 = vmatprep.subr.mxu1 %v301_v14  ;;  %v378_v14 = vld [vmem:[#allocation5 + $0x4a0] sm:$0xff] }
  0x98   : > { %753 = vmatpush1.msra.mxu0 %v300_v15  ;;  %1173 = vmatpush1.msra.mxu1 %v300_v15  ;;  %v1742_v15 = vld [vmem:[%s1608_s20 + $0xc0] sm:$0xff] }
  0x99   : > { %754 = vmatprep.subr.mxu0 %v295_v16  ;;  %1142 = vmatprep.subr.mxu1 %v295_v16  ;;  %v373_v16 = vld [vmem:[#allocation5 + $0x478] sm:$0xff] }
  0x9a   : > { %504 = vmatprep.mubr.f32.mxu0 %v1649_v17  ;;  %665 = vmatprep.mubr.f32.mxu1 %v1649_v17 }
  0x9b   : > { %755 = vmatpush1.msra.mxu0 %v294_v18  ;;  %1174 = vmatpush1.msra.mxu1 %v294_v18  ;;  %v372_v18 = vld [vmem:[#allocation5 + $0x470] sm:$0xff] }
  0x9c   : > { %505 = vmatmul.mubr.f32.gmra.mxu0 %v1652_v19  ;;  %666 = vmatmul.mubr.f32.gmra.mxu1 %v1652_v19 }
  0x9d   : > { %756 = vmatprep.subr.mxu0 %v289_v20  ;;  %1143 = vmatprep.subr.mxu1 %v289_v20  ;;  %v367_v20 = vld [vmem:[#allocation5 + $0x448] sm:$0xff] }
  0x9e   : > { %757 = vmatpush1.msra.mxu0 %v288_v21  ;;  %1175 = vmatpush1.msra.mxu1 %v288_v21  ;;  %v1749_v21 = vld [vmem:[%s1608_s20 + $0xd8] sm:$0xff] }
  0x9f   : > { %758 = vmatprep.subr.mxu0 %v283_v22  ;;  %1144 = vmatprep.subr.mxu1 %v283_v22  ;;  %v366_v22 = vld [vmem:[#allocation5 + $0x440] sm:$0xff] }
  0xa0   : > { %510 = vmatprep.mubr.f32.mxu0 %v1659_v23  ;;  %671 = vmatprep.mubr.f32.mxu1 %v1659_v23 }
  0xa1   : > { %759 = vmatpush1.msra.mxu0 %v282_v24  ;;  %1176 = vmatpush1.msra.mxu1 %v282_v24  ;;  %v1752_v24 = vld [vmem:[%s1608_s20 + $0xd0] sm:$0xff] }
  0xa2   : > { %511 = vmatmul.mubr.f32.gmra.mxu0 %v1662_v25  ;;  %672 = vmatmul.mubr.f32.gmra.mxu1 %v1662_v25 }
  0xa3   : > { %760 = vmatprep.subr.mxu0 %v277_v26  ;;  %1145 = vmatprep.subr.mxu1 %v277_v26  ;;  %v361_v26 = vld [vmem:[#allocation5 + $0x418] sm:$0xff] }
  0xa4   : > { %761 = vmatpush1.msra.mxu0 %v276_v27  ;;  %1177 = vmatpush1.msra.mxu1 %v276_v27  ;;  %v360_v27 = vld [vmem:[#allocation5 + $0x410] sm:$0xff] }
  0xa5   : > { %762 = vmatprep.subr.mxu0 %v271_v28  ;;  %1146 = vmatprep.subr.mxu1 %v271_v28  ;;  %v355_v28 = vld [vmem:[#allocation5 + $0x3e8] sm:$0xff] }
  0xa6   : > { %516 = vmatprep.mubr.f32.mxu0 %v1669_v29  ;;  %677 = vmatprep.mubr.f32.mxu1 %v1669_v29 }
  0xa7   : > { %763 = vmatpush1.msra.mxu0 %v270_v30  ;;  %1178 = vmatpush1.msra.mxu1 %v270_v30  ;;  %v1759_v30 = vld [vmem:[%s1608_s20 + $0xe8] sm:$0xff] }
  0xa8   : > { %517 = vmatmul.mubr.f32.gmra.mxu0 %v1672_v31  ;;  %678 = vmatmul.mubr.f32.gmra.mxu1 %v1672_v31 }
  0xa9   : > { %764 = vmatprep.subr.mxu0 %v265_v32  ;;  %1147 = vmatprep.subr.mxu1 %v265_v32  ;;  %v354_v32 = vld [vmem:[#allocation5 + $0x3e0] sm:$0xff] }
  0xaa   : > { %765 = vmatpush1.msra.mxu0 %v264_v33  ;;  %1179 = vmatpush1.msra.mxu1 %v264_v33  ;;  %v1762_v33 = vld [vmem:[%s1608_s20 + $0xe0] sm:$0xff] }
  0xab   : > { %766 = vmatprep.subr.mxu0 %v259_v34  ;;  %1148 = vmatprep.subr.mxu1 %v259_v34  ;;  %v349_v34 = vld [vmem:[#allocation5 + $0x3b8] sm:$0xff] }
  0xac   : > { %522 = vmatprep.mubr.f32.mxu0 %v1679_v35  ;;  %683 = vmatprep.mubr.f32.mxu1 %v1679_v35 }
  0xad   : > { %767 = vmatpush1.msra.mxu0 %v258_v36  ;;  %1180 = vmatpush1.msra.mxu1 %v258_v36  ;;  %v348_v36 = vld [vmem:[#allocation5 + $0x3b0] sm:$0xff] }
  0xae   : > { %523 = vmatmul.mubr.f32.gmra.mxu0 %v1682_v37  ;;  %684 = vmatmul.mubr.f32.gmra.mxu1 %v1682_v37 }
  0xaf   : > { %768 = vmatprep.subr.mxu0 %v253_v38  ;;  %1149 = vmatprep.subr.mxu1 %v253_v38  ;;  %v343_v38 = vld [vmem:[#allocation5 + $0x388] sm:$0xff] }
  0xb0   : > { %769 = vmatpush1.msra.mxu0 %v252_v39  ;;  %1181 = vmatpush1.msra.mxu1 %v252_v39  ;;  %v229_v39 = vld [vmem:[%s1608_s20 + $0xf8] sm:$0xff] }
  0xb1   : > { %770 = vmatprep.subr.mxu0 %v247_v40  ;;  %1150 = vmatprep.subr.mxu1 %v247_v40  ;;  %v342_v40 = vld [vmem:[#allocation5 + $0x380] sm:$0xff] }
  0xb2   : > { %528 = vmatprep.mubr.f32.mxu0 %v1689_v41  ;;  %689 = vmatprep.mubr.f32.mxu1 %v1689_v41 }
  0xb3   : > { %771 = vmatpush1.msra.mxu0 %v246_v42  ;;  %1182 = vmatpush1.msra.mxu1 %v246_v42  ;;  %v228_v42 = vld [vmem:[%s1608_s20 + $0xf0] sm:$0xff] }
  0xb4   : > { %529 = vmatmul.mubr.f32.gmra.mxu0 %v1692_v43  ;;  %690 = vmatmul.mubr.f32.gmra.mxu1 %v1692_v43 }
  0xb5   : > { %772 = vmatprep.subr.mxu0 %v241_v44  ;;  %1151 = vmatprep.subr.mxu1 %v241_v44  ;;  %v337_v44 = vld [vmem:[#allocation5 + $0x358] sm:$0xff] }
  0xb6   : > { %773 = vmatpush1.msra.mxu0 %v240_v45  ;;  %1183 = vmatpush1.msra.mxu1 %v240_v45  ;;  %v336_v45 = vld [vmem:[#allocation5 + $0x350] sm:$0xff] }
  0xb7   : > { %774 = vmatprep.subr.mxu0 %v235_v46  ;;  %1152 = vmatprep.subr.mxu1 %v235_v46  ;;  %v331_v46 = vld [vmem:[#allocation5 + $0x328] sm:$0xff] }
  0xb8   : > { %534 = vmatprep.mubr.f32.mxu0 %v1699_v47  ;;  %695 = vmatprep.mubr.f32.mxu1 %v1699_v47 }
  0xb9   : > { %775 = vmatpush1.msra.mxu0 %v234_v48  ;;  %1184 = vmatpush1.msra.mxu1 %v234_v48  ;;  %v330_v48 = vld [vmem:[#allocation5 + $0x320] sm:$0xff] }
  0xba   : > { %535 = vmatmul.mubr.f32.gmra.mxu0 %v1702_v49  ;;  %696 = vmatmul.mubr.f32.gmra.mxu1 %v1702_v49 }
  0xbb   : > { %776 = vmatprep.subr.mxu0 %v421_v50  ;;  %1153 = vmatprep.subr.mxu1 %v421_v50 }
  0xbc   : > { %777 = vmatpush2.msra.mxu0 %v420_v51  ;;  %1185 = vmatpush2.msra.mxu1 %v420_v51 }
  0xbd   : > { %778 = vmatprep.subr.mxu0 %v415_v52  ;;  %1154 = vmatprep.subr.mxu1 %v415_v52 }
  0xbe   : > { %540 = vmatprep.mubr.f32.mxu0 %v1709_v53  ;;  %701 = vmatprep.mubr.f32.mxu1 %v1709_v53 }
  0xbf   : > { %779 = vmatpush2.msra.mxu0 %v414_v54  ;;  %1186 = vmatpush2.msra.mxu1 %v414_v54 }
  0xc0   : > { %541 = vmatmul.mubr.f32.gmra.mxu0 %v1712_v55  ;;  %702 = vmatmul.mubr.f32.gmra.mxu1 %v1712_v55 }
  0xc1   : > { %780 = vmatprep.subr.mxu0 %v409_v56  ;;  %1155 = vmatprep.subr.mxu1 %v409_v56 }
  0xc2   : > { %781 = vmatpush2.msra.mxu0 %v408_v57  ;;  %1187 = vmatpush2.msra.mxu1 %v408_v57 }
  0xc3   : > { %782 = vmatprep.subr.mxu0 %v403_v58  ;;  %1156 = vmatprep.subr.mxu1 %v403_v58 }
  0xc4   : > { %546 = vmatprep.mubr.f32.mxu0 %v1719_v59  ;;  %707 = vmatprep.mubr.f32.mxu1 %v1719_v59 }
  0xc5   : > { %783 = vmatpush2.msra.mxu0 %v402_v60  ;;  %1188 = vmatpush2.msra.mxu1 %v402_v60 }
  0xc6   : > { %547 = vmatmul.mubr.f32.gmra.mxu0 %v1722_v61  ;;  %708 = vmatmul.mubr.f32.gmra.mxu1 %v1722_v61 }
  0xc7   : > { %784 = vmatprep.subr.mxu0 %v397_v62  ;;  %1157 = vmatprep.subr.mxu1 %v397_v62 }
  0xc8   : > { %785 = vmatpush2.msra.mxu0 %v396_v0  ;;  %1189 = vmatpush2.msra.mxu1 %v396_v0 }
  0xc9   : > { %786 = vmatprep.subr.mxu0 %v391_v2  ;;  %1158 = vmatprep.subr.mxu1 %v391_v2 }
  0xca   : > { %552 = vmatprep.mubr.f32.mxu0 %v1729_v3  ;;  %713 = vmatprep.mubr.f32.mxu1 %v1729_v3 }
  0xcb   : > { %787 = vmatpush2.msra.mxu0 %v390_v4  ;;  %1190 = vmatpush2.msra.mxu1 %v390_v4 }
  0xcc   : > { %553 = vmatmul.mubr.f32.gmra.mxu0 %v1732_v6  ;;  %714 = vmatmul.mubr.f32.gmra.mxu1 %v1732_v6 }
  0xcd   : > { %788 = vmatprep.subr.mxu0 %v385_v8  ;;  %1159 = vmatprep.subr.mxu1 %v385_v8 }
  0xce   : > { %789 = vmatpush2.msra.mxu0 %v384_v9  ;;  %1191 = vmatpush2.msra.mxu1 %v384_v9 }
  0xcf   : > { %790 = vmatprep.subr.mxu0 %v379_v10  ;;  %1160 = vmatprep.subr.mxu1 %v379_v10 }
  0xd0   : > { %558 = vmatprep.mubr.f32.mxu0 %v1739_v12  ;;  %719 = vmatprep.mubr.f32.mxu1 %v1739_v12 }
  0xd1   : > { %791 = vmatpush2.msra.mxu0 %v378_v14  ;;  %1192 = vmatpush2.msra.mxu1 %v378_v14 }
  0xd2   : > { %559 = vmatmul.mubr.f32.gmra.mxu0 %v1742_v15  ;;  %720 = vmatmul.mubr.f32.gmra.mxu1 %v1742_v15 }
  0xd3   : > { %792 = vmatprep.subr.mxu0 %v373_v16  ;;  %1161 = vmatprep.subr.mxu1 %v373_v16 }
  0xd4   : > { %793 = vmatpush2.msra.mxu0 %v372_v18  ;;  %1193 = vmatpush2.msra.mxu1 %v372_v18 }
  0xd5   : > { %794 = vmatprep.subr.mxu0 %v367_v20  ;;  %1162 = vmatprep.subr.mxu1 %v367_v20 }
  0xd6   : > { %564 = vmatprep.mubr.f32.mxu0 %v1749_v21  ;;  %725 = vmatprep.mubr.f32.mxu1 %v1749_v21 }
  0xd7   : > { %795 = vmatpush2.msra.mxu0 %v366_v22  ;;  %1194 = vmatpush2.msra.mxu1 %v366_v22 }
  0xd8   : > { %565 = vmatmul.mubr.f32.gmra.mxu0 %v1752_v24  ;;  %726 = vmatmul.mubr.f32.gmra.mxu1 %v1752_v24 }
  0xd9   : > { %796 = vmatprep.subr.mxu0 %v361_v26  ;;  %1163 = vmatprep.subr.mxu1 %v361_v26 }
  0xda   : > { %797 = vmatpush2.msra.mxu0 %v360_v27  ;;  %1195 = vmatpush2.msra.mxu1 %v360_v27 }
  0xdb   : > { %798 = vmatprep.subr.mxu0 %v355_v28  ;;  %1164 = vmatprep.subr.mxu1 %v355_v28 }
  0xdc   : > { %570 = vmatprep.mubr.f32.mxu0 %v1759_v30  ;;  %731 = vmatprep.mubr.f32.mxu1 %v1759_v30 }
  0xdd   : > { %799 = vmatpush2.msra.mxu0 %v354_v32  ;;  %1196 = vmatpush2.msra.mxu1 %v354_v32 }
  0xde   : > { %571 = vmatmul.mubr.f32.gmra.mxu0 %v1762_v33  ;;  %732 = vmatmul.mubr.f32.gmra.mxu1 %v1762_v33 }
  0xdf   : > { %800 = vmatprep.subr.mxu0 %v349_v34  ;;  %1165 = vmatprep.subr.mxu1 %v349_v34 }
  0xe0   : > { %801 = vmatpush2.msra.mxu0 %v348_v36  ;;  %1197 = vmatpush2.msra.mxu1 %v348_v36 }
  0xe1   : > { %802 = vmatprep.subr.mxu0 %v343_v38  ;;  %1166 = vmatprep.subr.mxu1 %v343_v38 }
  0xe2   : > { %576 = vmatprep.mubr.f32.mxu0 %v229_v39  ;;  %737 = vmatprep.mubr.f32.mxu1 %v229_v39 }
  0xe3   : > { %803 = vmatpush2.msra.mxu0 %v342_v40  ;;  %1198 = vmatpush2.msra.mxu1 %v342_v40 }
  0xe4   : > { %577 = vmatmul.mubr.f32.gmra.mxu0 %v228_v42  ;;  %738 = vmatmul.mubr.f32.gmra.mxu1 %v228_v42 }
  0xe5   : > { %804 = vmatprep.subr.mxu0 %v337_v44  ;;  %1167 = vmatprep.subr.mxu1 %v337_v44 }
  0xe6   : > { %805 = vmatpush2.msra.mxu0 %v336_v45  ;;  %1199 = vmatpush2.msra.mxu1 %v336_v45 }
  0xe7   : > { %806 = vmatprep.subr.mxu0 %v331_v46  ;;  %1168 = vmatprep.subr.mxu1 %v331_v46 }
  0xe8   : > { %807 = vmatpush2.msra.mxu0 %v330_v48  ;;  %1200 = vmatpush2.msra.mxu1 %v330_v48 }
  0xe9   : > { %808 = vmatprep.mubr.f32.mxu0 %v1619_v63  ;;  %856 = vmatprep.mubr.f32.mxu1 %v1699_v47 }
  0xea   : > { %809 = vmatmul.mubr.f32.vlgmr.msra.gmra.mxu0 %v1622_v1  ;;  %857 = vmatmul.mubr.f32.vlgmr.msra.gmra.mxu1 %v1702_v49 }
  0xeb   : > { %814 = vmatprep.mubr.f32.mxu0 %v1629_v5  ;;  %862 = vmatprep.mubr.f32.mxu1 %v1709_v53 }
  0xee   : > { %815 = vmatmul.mubr.f32.gmra.mxu0 %v1632_v7  ;;  %863 = vmatmul.mubr.f32.gmra.mxu1 %v1712_v55 }
  0xef   : > { %820 = vmatprep.mubr.f32.mxu0 %v1639_v11  ;;  %868 = vmatprep.mubr.f32.mxu1 %v1719_v59 }
  0xf2   : > { %821 = vmatmul.mubr.f32.gmra.mxu0 %v1642_v13  ;;  %869 = vmatmul.mubr.f32.gmra.mxu1 %v1722_v61 }
  0xf3   : > { %826 = vmatprep.mubr.f32.mxu0 %v1649_v17  ;;  %874 = vmatprep.mubr.f32.mxu1 %v1729_v3 }
  0xf6   : > { %827 = vmatmul.mubr.f32.gmra.mxu0 %v1652_v19  ;;  %875 = vmatmul.mubr.f32.gmra.mxu1 %v1732_v6 }
  0xf7   : > { %832 = vmatprep.mubr.f32.mxu0 %v1659_v23  ;;  %880 = vmatprep.mubr.f32.mxu1 %v1739_v12 }
  0xfa   : > { %833 = vmatmul.mubr.f32.gmra.mxu0 %v1662_v25  ;;  %881 = vmatmul.mubr.f32.gmra.mxu1 %v1742_v15 }
  0xfb   : > { %838 = vmatprep.mubr.f32.mxu0 %v1669_v29  ;;  %886 = vmatprep.mubr.f32.mxu1 %v1749_v21 }
  0xfe   : > { %839 = vmatmul.mubr.f32.gmra.mxu0 %v1672_v31  ;;  %887 = vmatmul.mubr.f32.gmra.mxu1 %v1752_v24 }
  0xff   : > { %844 = vmatprep.mubr.f32.mxu0 %v1679_v35  ;;  %892 = vmatprep.mubr.f32.mxu1 %v1759_v30 }
 0x102   : > { %845 = vmatmul.mubr.f32.gmra.mxu0 %v1682_v37  ;;  %893 = vmatmul.mubr.f32.gmra.mxu1 %v1762_v33 }
 0x103   : > { %850 = vmatprep.mubr.f32.mxu0 %v1689_v41  ;;  %898 = vmatprep.mubr.f32.mxu1 %v229_v39 }
 0x106   : > { %851 = vmatmul.mubr.f32.gmra.mxu0 %v1692_v43  ;;  %899 = vmatmul.mubr.f32.gmra.mxu1 %v228_v42 }
 0x14a   : > { %v488_v63 = vpop.f32.mrf.mxu0  ;;  %v649_v1 = vpop.f32.mrf.mxu1 }
 0x14b   : > { %905 = vst [vmem:[%s1801_s21] sm:$0xff] %v488_v63  ;;  %907 = vst [vmem:[%s1801_s21 + $0x10] sm:$0xff] %v649_v1 }
 0x14c   : > { %v490_v5 = vpop.f32.mrf.mxu0  ;;  %v651_v7 = vpop.f32.mrf.mxu1 }
 0x14d   : > { %906 = vst [vmem:[%s1801_s21 + $0x8] sm:$0xff] %v490_v5  ;;  %908 = vst [vmem:[%s1801_s21 + $0x18] sm:$0xff] %v651_v7 }
 0x150   : > { %v494_v11 = vpop.f32.mrf.mxu0  ;;  %v655_v13 = vpop.f32.mrf.mxu1 }
 0x151   : > { %911 = vst [vmem:[%s1801_s21 + $0x30] sm:$0xff] %v494_v11  ;;  %913 = vst [vmem:[%s1801_s21 + $0x40] sm:$0xff] %v655_v13 }
 0x152   : > { %v496_v17 = vpop.f32.mrf.mxu0  ;;  %v657_v19 = vpop.f32.mrf.mxu1 }
 0x153   : > { %912 = vst [vmem:[%s1801_s21 + $0x38] sm:$0xff] %v496_v17  ;;  %914 = vst [vmem:[%s1801_s21 + $0x48] sm:$0xff] %v657_v19 }
 0x156   : > { %v500_v23 = vpop.f32.mrf.mxu0  ;;  %v661_v25 = vpop.f32.mrf.mxu1 }
 0x157   : > { %917 = vst [vmem:[%s1801_s21 + $0x60] sm:$0xff] %v500_v23  ;;  %919 = vst [vmem:[%s1801_s21 + $0x70] sm:$0xff] %v661_v25 }
 0x158   : > { %v502_v29 = vpop.f32.mrf.mxu0  ;;  %v663_v31 = vpop.f32.mrf.mxu1 }
 0x159   : > { %918 = vst [vmem:[%s1801_s21 + $0x68] sm:$0xff] %v502_v29  ;;  %920 = vst [vmem:[%s1801_s21 + $0x78] sm:$0xff] %v663_v31 }
 0x15c   : > { %v506_v35 = vpop.f32.mrf.mxu0  ;;  %v667_v37 = vpop.f32.mrf.mxu1 }
 0x15d   : > { %923 = vst [vmem:[%s1801_s21 + $0x90] sm:$0xff] %v506_v35  ;;  %925 = vst [vmem:[%s1801_s21 + $0xa0] sm:$0xff] %v667_v37 }
 0x15e   : > { %v508_v41 = vpop.f32.mrf.mxu0  ;;  %v669_v43 = vpop.f32.mrf.mxu1 }
 0x15f   : > { %924 = vst [vmem:[%s1801_s21 + $0x98] sm:$0xff] %v508_v41  ;;  %926 = vst [vmem:[%s1801_s21 + $0xa8] sm:$0xff] %v669_v43 }
 0x162   : > { %v512_v47 = vpop.f32.mrf.mxu0  ;;  %v673_v49 = vpop.f32.mrf.mxu1 }
 0x163   : > { %929 = vst [vmem:[%s1801_s21 + $0xc0] sm:$0xff] %v512_v47  ;;  %931 = vst [vmem:[%s1801_s21 + $0xd0] sm:$0xff] %v673_v49 }
 0x164   : > { %v514_v50 = vpop.f32.mrf.mxu0  ;;  %v675_v51 = vpop.f32.mrf.mxu1 }
 0x165   : > { %930 = vst [vmem:[%s1801_s21 + $0xc8] sm:$0xff] %v514_v50  ;;  %932 = vst [vmem:[%s1801_s21 + $0xd8] sm:$0xff] %v675_v51 }
 0x168   : > { %v518_v52 = vpop.f32.mrf.mxu0  ;;  %v679_v53 = vpop.f32.mrf.mxu1 }
 0x169   : > { %935 = vst [vmem:[%s1801_s21 + $0xf0] sm:$0xff] %v518_v52  ;;  %937 = vst [vmem:[%s1801_s21 + $0x100] sm:$0xff] %v679_v53 }
 0x16a   : > { %v520_v54 = vpop.f32.mrf.mxu0  ;;  %v681_v55 = vpop.f32.mrf.mxu1 }
 0x16b   : > { %936 = vst [vmem:[%s1801_s21 + $0xf8] sm:$0xff] %v520_v54  ;;  %938 = vst [vmem:[%s1801_s21 + $0x108] sm:$0xff] %v681_v55 }
 0x16e   : > { %v524_v56 = vpop.f32.mrf.mxu0  ;;  %v685_v57 = vpop.f32.mrf.mxu1 }
 0x16f   : > { %941 = vst [vmem:[%s1801_s21 + $0x120] sm:$0xff] %v524_v56  ;;  %943 = vst [vmem:[%s1801_s21 + $0x130] sm:$0xff] %v685_v57 }
 0x170   : > { %v526_v58 = vpop.f32.mrf.mxu0  ;;  %v687_v59 = vpop.f32.mrf.mxu1 }
 0x171   : > { %942 = vst [vmem:[%s1801_s21 + $0x128] sm:$0xff] %v526_v58  ;;  %944 = vst [vmem:[%s1801_s21 + $0x138] sm:$0xff] %v687_v59 }
 0x174   : > { %v530_v60 = vpop.f32.mrf.mxu0  ;;  %v691_v61 = vpop.f32.mrf.mxu1 }
 0x175   : > { %947 = vst [vmem:[%s1801_s21 + $0x150] sm:$0xff] %v530_v60  ;;  %949 = vst [vmem:[%s1801_s21 + $0x160] sm:$0xff] %v691_v61 }
 0x176   : > { %v532_v62 = vpop.f32.mrf.mxu0  ;;  %v693_v0 = vpop.f32.mrf.mxu1 }
 0x177   : > { %948 = vst [vmem:[%s1801_s21 + $0x158] sm:$0xff] %v532_v62  ;;  %950 = vst [vmem:[%s1801_s21 + $0x168] sm:$0xff] %v693_v0 }
 0x17a   : > { %v536_v2 = vpop.f32.mrf.mxu0  ;;  %v697_v3 = vpop.f32.mrf.mxu1 }
 0x17b   : > { %953 = vst [vmem:[%s1801_s21 + $0x180] sm:$0xff] %v536_v2  ;;  %955 = vst [vmem:[%s1801_s21 + $0x190] sm:$0xff] %v697_v3 }
 0x17c   : > { %v538_v4 = vpop.f32.mrf.mxu0  ;;  %v699_v6 = vpop.f32.mrf.mxu1 }
 0x17d   : > { %954 = vst [vmem:[%s1801_s21 + $0x188] sm:$0xff] %v538_v4  ;;  %956 = vst [vmem:[%s1801_s21 + $0x198] sm:$0xff] %v699_v6 }
 0x180   : > { %v542_v8 = vpop.f32.mrf.mxu0  ;;  %v703_v9 = vpop.f32.mrf.mxu1 }
 0x181   : > { %959 = vst [vmem:[%s1801_s21 + $0x1b0] sm:$0xff] %v542_v8  ;;  %961 = vst [vmem:[%s1801_s21 + $0x1c0] sm:$0xff] %v703_v9 }
 0x182   : > { %v544_v10 = vpop.f32.mrf.mxu0  ;;  %v705_v12 = vpop.f32.mrf.mxu1 }
 0x183   : > { %960 = vst [vmem:[%s1801_s21 + $0x1b8] sm:$0xff] %v544_v10  ;;  %962 = vst [vmem:[%s1801_s21 + $0x1c8] sm:$0xff] %v705_v12 }
 0x186   : > { %v548_v14 = vpop.f32.mrf.mxu0  ;;  %v709_v15 = vpop.f32.mrf.mxu1 }
 0x187   : > { %965 = vst [vmem:[%s1801_s21 + $0x1e0] sm:$0xff] %v548_v14  ;;  %967 = vst [vmem:[%s1801_s21 + $0x1f0] sm:$0xff] %v709_v15 }
 0x188   : > { %v550_v16 = vpop.f32.mrf.mxu0  ;;  %v711_v18 = vpop.f32.mrf.mxu1 }
 0x189   : > { %966 = vst [vmem:[%s1801_s21 + $0x1e8] sm:$0xff] %v550_v16  ;;  %968 = vst [vmem:[%s1801_s21 + $0x1f8] sm:$0xff] %v711_v18 }
 0x18c   : > { %v554_v20 = vpop.f32.mrf.mxu0  ;;  %v715_v21 = vpop.f32.mrf.mxu1 }
 0x18d   : > { %971 = vst [vmem:[%s1801_s21 + $0x210] sm:$0xff] %v554_v20  ;;  %973 = vst [vmem:[%s1801_s21 + $0x220] sm:$0xff] %v715_v21 }
 0x18e   : > { %v556_v22 = vpop.f32.mrf.mxu0  ;;  %v717_v24 = vpop.f32.mrf.mxu1 }
 0x18f   : > { %972 = vst [vmem:[%s1801_s21 + $0x218] sm:$0xff] %v556_v22  ;;  %974 = vst [vmem:[%s1801_s21 + $0x228] sm:$0xff] %v717_v24 }
 0x192   : > { %v560_v26 = vpop.f32.mrf.mxu0  ;;  %v721_v27 = vpop.f32.mrf.mxu1 }
 0x193   : > { %977 = vst [vmem:[%s1801_s21 + $0x240] sm:$0xff] %v560_v26  ;;  %979 = vst [vmem:[%s1801_s21 + $0x250] sm:$0xff] %v721_v27 }
 0x194   : > { %v562_v28 = vpop.f32.mrf.mxu0  ;;  %v723_v30 = vpop.f32.mrf.mxu1 }
 0x195   : > { %978 = vst [vmem:[%s1801_s21 + $0x248] sm:$0xff] %v562_v28  ;;  %980 = vst [vmem:[%s1801_s21 + $0x258] sm:$0xff] %v723_v30 }
 0x198   : > { %v566_v32 = vpop.f32.mrf.mxu0  ;;  %v727_v33 = vpop.f32.mrf.mxu1 }
 0x199   : > { %983 = vst [vmem:[%s1801_s21 + $0x270] sm:$0xff] %v566_v32  ;;  %985 = vst [vmem:[%s1801_s21 + $0x280] sm:$0xff] %v727_v33 }
 0x19a   : > { %v568_v34 = vpop.f32.mrf.mxu0  ;;  %v729_v36 = vpop.f32.mrf.mxu1 }
 0x19b   : > { %984 = vst [vmem:[%s1801_s21 + $0x278] sm:$0xff] %v568_v34  ;;  %986 = vst [vmem:[%s1801_s21 + $0x288] sm:$0xff] %v729_v36 }
 0x19e   : > { %v572_v38 = vpop.f32.mrf.mxu0  ;;  %v733_v39 = vpop.f32.mrf.mxu1 }
 0x19f   : > { %989 = vst [vmem:[%s1801_s21 + $0x2a0] sm:$0xff] %v572_v38  ;;  %991 = vst [vmem:[%s1801_s21 + $0x2b0] sm:$0xff] %v733_v39 }
 0x1a0   : > { %v574_v40 = vpop.f32.mrf.mxu0  ;;  %v735_v42 = vpop.f32.mrf.mxu1 }
 0x1a1   : > { %990 = vst [vmem:[%s1801_s21 + $0x2a8] sm:$0xff] %v574_v40  ;;  %992 = vst [vmem:[%s1801_s21 + $0x2b8] sm:$0xff] %v735_v42 }
 0x1a4   : > { %v578_v44 = vpop.f32.mrf.mxu0  ;;  %v739_v45 = vpop.f32.mrf.mxu1 }
 0x1a5   : > { %995 = vst [vmem:[%s1801_s21 + $0x2d0] sm:$0xff] %v578_v44  ;;  %997 = vst [vmem:[%s1801_s21 + $0x2e0] sm:$0xff] %v739_v45 }
 0x1a6   : > { %v580_v46 = vpop.f32.mrf.mxu0  ;;  %v741_v48 = vpop.f32.mrf.mxu1 }
 0x1a7   : > { %996 = vst [vmem:[%s1801_s21 + $0x2d8] sm:$0xff] %v580_v46  ;;  %998 = vst [vmem:[%s1801_s21 + $0x2e8] sm:$0xff] %v741_v48 }
 0x1aa   : > { %v810_v63 = vpop.f32.mrf.mxu0  ;;  %v858_v1 = vpop.f32.mrf.mxu1 }
 0x1ab   : > { %909 = vst [vmem:[%s1801_s21 + $0x20] sm:$0xff] %v810_v63  ;;  %957 = vst [vmem:[%s1801_s21 + $0x1a0] sm:$0xff] %v858_v1 }
 0x1ac   : > { %v812_v5 = vpop.f32.mrf.mxu0  ;;  %v860_v7 = vpop.f32.mrf.mxu1 }
 0x1ad   : > { %910 = vst [vmem:[%s1801_s21 + $0x28] sm:$0xff] %v812_v5  ;;  %958 = vst [vmem:[%s1801_s21 + $0x1a8] sm:$0xff] %v860_v7 }
 0x1ae   : > { %v816_v11 = vpop.f32.mrf.mxu0  ;;  %v864_v13 = vpop.f32.mrf.mxu1 }
 0x1af   : > { %915 = vst [vmem:[%s1801_s21 + $0x50] sm:$0xff] %v816_v11  ;;  %963 = vst [vmem:[%s1801_s21 + $0x1d0] sm:$0xff] %v864_v13 }
 0x1b0   : > { %v818_v17 = vpop.f32.mrf.mxu0  ;;  %v866_v19 = vpop.f32.mrf.mxu1 }
 0x1b1   : > { %916 = vst [vmem:[%s1801_s21 + $0x58] sm:$0xff] %v818_v17  ;;  %964 = vst [vmem:[%s1801_s21 + $0x1d8] sm:$0xff] %v866_v19 }
 0x1b2   : > { %v822_v23 = vpop.f32.mrf.mxu0  ;;  %v870_v25 = vpop.f32.mrf.mxu1 }
 0x1b3   : > { %921 = vst [vmem:[%s1801_s21 + $0x80] sm:$0xff] %v822_v23  ;;  %969 = vst [vmem:[%s1801_s21 + $0x200] sm:$0xff] %v870_v25 }
 0x1b4   : > { %v824_v29 = vpop.f32.mrf.mxu0  ;;  %v872_v31 = vpop.f32.mrf.mxu1 }
 0x1b5   : > { %922 = vst [vmem:[%s1801_s21 + $0x88] sm:$0xff] %v824_v29  ;;  %970 = vst [vmem:[%s1801_s21 + $0x208] sm:$0xff] %v872_v31 }
 0x1b6   : > { %v828_v35 = vpop.f32.mrf.mxu0  ;;  %v876_v37 = vpop.f32.mrf.mxu1 }
 0x1b7   : > { %927 = vst [vmem:[%s1801_s21 + $0xb0] sm:$0xff] %v828_v35  ;;  %975 = vst [vmem:[%s1801_s21 + $0x230] sm:$0xff] %v876_v37 }
 0x1b8   : > { %v830_v41 = vpop.f32.mrf.mxu0  ;;  %v878_v43 = vpop.f32.mrf.mxu1 }
 0x1b9   : > { %928 = vst [vmem:[%s1801_s21 + $0xb8] sm:$0xff] %v830_v41  ;;  %976 = vst [vmem:[%s1801_s21 + $0x238] sm:$0xff] %v878_v43 }
 0x1ba   : > { %v834_v47 = vpop.f32.mrf.mxu0  ;;  %v882_v49 = vpop.f32.mrf.mxu1 }
 0x1bb   : > { %933 = vst [vmem:[%s1801_s21 + $0xe0] sm:$0xff] %v834_v47  ;;  %981 = vst [vmem:[%s1801_s21 + $0x260] sm:$0xff] %v882_v49 }
 0x1bc   : > { %v836_v50 = vpop.f32.mrf.mxu0  ;;  %v884_v51 = vpop.f32.mrf.mxu1 }
 0x1bd   : > { %934 = vst [vmem:[%s1801_s21 + $0xe8] sm:$0xff] %v836_v50  ;;  %982 = vst [vmem:[%s1801_s21 + $0x268] sm:$0xff] %v884_v51 }
 0x1be   : > { %v840_v52 = vpop.f32.mrf.mxu0  ;;  %v888_v53 = vpop.f32.mrf.mxu1 }
 0x1bf   : > { %939 = vst [vmem:[%s1801_s21 + $0x110] sm:$0xff] %v840_v52  ;;  %987 = vst [vmem:[%s1801_s21 + $0x290] sm:$0xff] %v888_v53 }
 0x1c0   : > { %v842_v54 = vpop.f32.mrf.mxu0  ;;  %v890_v55 = vpop.f32.mrf.mxu1 }
 0x1c1   : > { %940 = vst [vmem:[%s1801_s21 + $0x118] sm:$0xff] %v842_v54  ;;  %988 = vst [vmem:[%s1801_s21 + $0x298] sm:$0xff] %v890_v55 }
 0x1c2   : > { %v846_v56 = vpop.f32.mrf.mxu0  ;;  %v894_v57 = vpop.f32.mrf.mxu1 }
 0x1c3   : > { %945 = vst [vmem:[%s1801_s21 + $0x140] sm:$0xff] %v846_v56  ;;  %993 = vst [vmem:[%s1801_s21 + $0x2c0] sm:$0xff] %v894_v57 }
 0x1c4   : > { %v848_v58 = vpop.f32.mrf.mxu0  ;;  %v896_v59 = vpop.f32.mrf.mxu1 }
 0x1c5   : > { %946 = vst [vmem:[%s1801_s21 + $0x148] sm:$0xff] %v848_v58  ;;  %994 = vst [vmem:[%s1801_s21 + $0x2c8] sm:$0xff] %v896_v59 }
 0x1c6   : > { %v852_v60 = vpop.f32.mrf.mxu0  ;;  %v900_v61 = vpop.f32.mrf.mxu1 }
 0x1c7   : > { %951 = vst [vmem:[%s1801_s21 + $0x170] sm:$0xff] %v852_v60  ;;  %999 = vst [vmem:[%s1801_s21 + $0x2f0] sm:$0xff] %v900_v61 }
 0x1c8   : > { %v854_v62 = vpop.f32.mrf.mxu0  ;;  %v902_v0 = vpop.f32.mrf.mxu1 }
 0x1c9   : > { %952 = vst [vmem:[%s1801_s21 + $0x178] sm:$0xff] %v854_v62  ;;  %1000 = vst [vmem:[%s1801_s21 + $0x2f8] sm:$0xff] %v902_v0 }
 0x1ca   : > { %1366 = shalt.err (!%p1363_p5)
}
 0x1cb   : > { %s1367_s26 = scalar_lea.hbm %s1901_s6, 12288  ;;  %s1371_s17 = scalar_lea.hbm %s1962_s2, 49152 }
 0x1cc   : > { %p1368_p4 = scmp.ne.s32.totalorder %s1901_s6, %s1367_s26  ;;  %p1372_p9 = scmp.lt.s32.totalorder %s1901_s6, %s1962_s2 }
 0x1cd   : > { %p1373_p10 = scmp.lt.s32.totalorder %s1371_s17, %s1367_s26 }
 0x1ce   : > { %p1369_p6 = pnand %p1368_p4, %p1567_p11 }
 0x1cf   : > { %p1374_p12 = por %p1373_p10, %p1372_p9 }
 0x1d0   : > { %p1370_p7 = pneg %p1369_p6 }
 0x1d2   : > { %p1375_p1 = pnand %p1374_p12, %p1370_p7 }
 0x1d4   : > { %1378 = shalt.err (!%p1375_p1)
}
 0x1d5   : > { %s1462_s21 = smov 768   ;;  %s1463_s23 = smov 48  }
 0x1d6   : > { %1210 = dma.vmem_to_hbm [thread:$0]  (%p1567_p11), %s1903_s13, 12288, %s1901_s6, %s1002_s24, %s1462_s21, %s1462_s21, %s1463_s23  }
 0x1d7 PF: > { %s1981_s3 = sld [smem:[#allocation12_spill]]  ;;  %p1227_p8 = scmp.ge.s32.totalorder %s1453_s16, 2 }
 0x1d8   : > { %s1033_s27 = sand.u32 1, %s1425_s9  }
 0x1d9   : > { %s1034_s12 = scalar_lea.sflag [#allocation4], %s1033_s27 }
 0x1dd   : > { %p1982_p13 = scmp.ne.s32.totalorder %s1981_s3, 0 }
 0x1df   : > { %p1221_p2 = pnand %p1227_p8, %p1982_p13 }
 0x1e1   : > { %p1222_p0 = pneg %p1221_p2 }
 0x1e3   : > { %1420 = dma.done.wait (%p1222_p0), %s1034_s12, 12288  }
 0x1e4   : > { %1422 = vsyncadd (%p1222_p0), %s1034_s12, 4294955008  ;;  %s19_s16 = sadd.s32 1, %s1453_s16   ;;  %s1983_s12 = sld [smem:[#allocation11_spill]] }
 0x1e5   : > { %p16_p3 = scmp.ge.s32.totalorder %s19_s16, 6   ;;  %s1984_s14 = sld [smem:[#allocation13_spill]] }
 0x1e6   : > { %s1985_s9 = smov %s1429_s10  ;;  %s1986_s10 = smov %s1433_s11 }
 0x1e7   : > { %s1987_s11 = smov %s1584_s29  ;;  %s1988_s13 = smov %s1449_s15 }
 0x1e8   : > { %s1989_s15 = smov %s1995_s4  ;;  %18 = sbr.rel (!%p16_p3) target bundleno = 10 (0xa), region = 77 }
 0x1ed   :  { %1039 = vsyncpa [#allocation3], 1 }
 0x1ee   :  { %1041 = vsyncpa [#allocation3 + $0x1], 1 }
 0x1ef   :  { %1042 = vsyncpa [#allocation6], 1 }
 0x1f0   :  { %1043 = vsyncpa [#allocation4], 1 }
 0x1f1   :  { %1045 = vsyncpa [#allocation4 + $0x1], 1 }

</bundles_post_ra>
